<compile_context>
chip_gen: v5e
topology: v5e:2x2
jax: 0.10.0
libtpu: 0.0.40
codegen_flags: <defaults>
</compile_context>

<pallas_src>
import jax
import jax.numpy as jnp
from jax.experimental import pallas as pl
from jax.experimental.pallas import tpu as pltpu

IN_FEATURES = 784
H = 512
OUT = 10
OUT_PAD = 128   # 10 -> 128 (lane-dense output store)


def _round_up(n, m):
    return ((n + m - 1) // m) * m


def _pick_tm(batch):
    """Batch tile: latency path for small B, big MXU-filling tiles for large B."""
    if batch <= 128:
        return max(8, _round_up(batch, 8))
    # Keep >= 2 grid steps so the 'parallel' axis shards across both v7x TensorCores.
    return min(512, _round_up(pl.cdiv(batch, 2), 128))


def mlp_kernel(x_ref, w1_ref, b1_ref, w2_ref, b2_ref, w3_ref, b3_ref, o_ref):
    # fc1: bf16 operands, f32 accumulate; bias+ReLU in f32, then cast to bf16.
    h1 = jnp.dot(x_ref[...], w1_ref[...], preferred_element_type=jnp.float32)
    h1 = jnp.maximum(h1 + b1_ref[...], 0.0).astype(jnp.bfloat16)
    # dropout -> identity (eval mode)
    # fc2
    h2 = jnp.dot(h1, w2_ref[...], preferred_element_type=jnp.float32)
    h2 = jnp.maximum(h2 + b2_ref[...], 0.0).astype(jnp.bfloat16)
    # dropout -> identity (eval mode)
    # fc3 (logits, no activation); padded N=128 keeps the store lane-dense
    out = jnp.dot(h2, w3_ref[...], preferred_element_type=jnp.float32) + b3_ref[...]
    o_ref[...] = out.astype(o_ref.dtype)


def prepare_params(params):
    """One-time cast/pad of f32 (in,out)-layout params into kernel operands.
    Call once at init; per-forward calls then do zero weight-side data movement."""
    w1, b1, w2, b2, w3, b3 = params
    w1k = jnp.asarray(w1, jnp.bfloat16)                            # (784, 512)
    w2k = jnp.asarray(w2, jnp.bfloat16)                            # (512, 512)
    w3k = jnp.zeros((H, OUT_PAD), jnp.bfloat16).at[:, :OUT].set(
        jnp.asarray(w3, jnp.bfloat16))                             # (512, 128)
    b1k = jnp.asarray(b1, jnp.float32).reshape(1, H)
    b2k = jnp.asarray(b2, jnp.float32).reshape(1, H)
    b3k = jnp.zeros((1, OUT_PAD), jnp.float32).at[:, :OUT].set(
        jnp.asarray(b3, jnp.float32).reshape(1, OUT))
    return (w1k, b1k, w2k, b2k, w3k, b3k)


def mnist_net_forward(x, kernel_params, tm=None):
    """x: any shape whose trailing dims flatten to 784 (e.g. [B,1,28,28]).
    kernel_params: output of prepare_params()."""
    w1k, b1k, w2k, b2k, w3k, b3k = kernel_params

    x2d = x.reshape(-1, IN_FEATURES).astype(jnp.bfloat16)   # single bf16 cast
    B = x2d.shape[0]
    if tm is None:
        tm = _pick_tm(B)
    Bp = _round_up(B, tm)
    xb = x2d if Bp == B else jnp.zeros((Bp, IN_FEATURES), jnp.bfloat16).at[:B].set(x2d)

    grid = (Bp // tm,)
    # Constant block index -> weights/biases DMA'd once and stay resident in VMEM.
    resident = lambda shape: pl.BlockSpec(shape, lambda i: (0, 0))

    flops = 2 * Bp * (IN_FEATURES * H + H * H + H * OUT_PAD)
    bytes_accessed = (xb.size * 2 + w1k.size * 2 + w2k.size * 2 + w3k.size * 2
                      + b1k.size * 4 + b2k.size * 4 + b3k.size * 4
                      + Bp * OUT_PAD * 4)

    out = pl.pallas_call(
        mlp_kernel,
        out_shape=jax.ShapeDtypeStruct((Bp, OUT_PAD), jnp.float32),
        grid=grid,
        in_specs=[
            pl.BlockSpec((tm, IN_FEATURES), lambda i: (i, 0)),  # x tile (pipelined)
            resident((IN_FEATURES, H)), resident((1, H)),        # fc1
            resident((H, H)),           resident((1, H)),        # fc2
            resident((H, OUT_PAD)),     resident((1, OUT_PAD)),  # fc3
        ],
        out_specs=pl.BlockSpec((tm, OUT_PAD), lambda i: (i, 0)),
        compiler_params=pltpu.CompilerParams(dimension_semantics=("parallel",)),
        cost_estimate=pl.CostEstimate(
            flops=flops, transcendentals=0, bytes_accessed=bytes_accessed),
    )(xb, w1k, b1k, w2k, b2k, w3k, b3k)

    return out[:B, :OUT]


def init_params(key):
    """Deterministic init mimicking torch.nn.Linear default (uniform +/- 1/sqrt(fan_in)).
    Weights stored transposed as (in, out) so the kernel computes x @ W + b."""
    def linear(key, fan_in, fan_out):
        kw, kb = jax.random.split(key)
        bound = 1.0 / jnp.sqrt(fan_in)
        w = jax.random.uniform(kw, (fan_in, fan_out), jnp.float32, -bound, bound)
        b = jax.random.uniform(kb, (1, fan_out), jnp.float32, -bound, bound)
        return w, b

    k1, k2, k3 = jax.random.split(key, 3)
    w1, b1 = linear(k1, 784, 512)
    w2, b2 = linear(k2, 512, 512)
    w3, b3 = linear(k3, 512, 10)
    return (w1, b1, w2, b2, w3, b3)


def reference_forward(x, params):
    w1, b1, w2, b2, w3, b3 = params
    x2d = x.reshape(-1, IN_FEATURES).astype(jnp.float32)
    h1 = jnp.maximum(x2d @ w1 + b1, 0.0)
    h2 = jnp.maximum(h1 @ w2 + b2, 0.0)
    return h2 @ w3 + b3


if __name__ == "__main__":
    key = jax.random.PRNGKey(0)
    kp, kx1, kx2 = jax.random.split(key, 3)
    params = init_params(kp)
    kernel_params = prepare_params(params)   # hoisted cast/pad, done once

    # 1) Small-batch / latency path: MNIST-shaped NCHW input, B=8 -> tm=8, grid=1.
    x_small = jax.random.normal(kx1, (8, 1, 28, 28), jnp.float32)
    out_small = jax.block_until_ready(mnist_net_forward(x_small, kernel_params))
    ref_small = reference_forward(x_small, params)
    assert out_small.shape == (8, 10), out_small.shape
    assert jnp.allclose(out_small, ref_small, atol=5e-2, rtol=5e-2), (
        "small-batch mismatch, max abs diff = %f"
        % float(jnp.max(jnp.abs(out_small - ref_small))))

    # 2) Larger batch exercises the padded / multi-step 'parallel' grid path
    #    (B=300 -> tm=256, Bp=512, grid=2).
    x_big = jax.random.normal(kx2, (300, 784), jnp.float32)
    out_big = jax.block_until_ready(mnist_net_forward(x_big, kernel_params))
    ref_big = reference_forward(x_big, params)
    assert out_big.shape == (300, 10), out_big.shape
    assert jnp.allclose(out_big, ref_big, atol=5e-2, rtol=5e-2), (
        "large-batch mismatch, max abs diff = %f"
        % float(jnp.max(jnp.abs(out_big - ref_big))))

    print("KERNEL_OK")
</pallas_src>

<mosaic_0001>
module attributes {stable_mosaic.version = 11 : i64} {
  func.func @mlp_kernel(%arg0: i32, %arg1: memref<8x784xbf16, #tpu.memory_space<vmem>>, %arg2: memref<784x512xbf16, #tpu.memory_space<vmem>>, %arg3: memref<1x512xf32, #tpu.memory_space<vmem>>, %arg4: memref<512x512xbf16, #tpu.memory_space<vmem>>, %arg5: memref<1x512xf32, #tpu.memory_space<vmem>>, %arg6: memref<512x128xbf16, #tpu.memory_space<vmem>>, %arg7: memref<1x128xf32, #tpu.memory_space<vmem>>, %arg8: memref<8x128xf32, #tpu.memory_space<vmem>>) attributes {dimension_semantics = [#tpu.dimension_semantics<parallel>], iteration_bounds = array<i64: 1>, scalar_prefetch = 0 : i64, scratch_operands = 0 : i64, tpu.core_type = #tpu.core_type<tc>, window_params = [{transform_indices = @transform_0, window_bounds = array<i64: 8, 784>}, {pipeline_mode = #tpu.pipeline_mode<synchronous>, transform_indices = @transform_1, window_bounds = array<i64: 784, 512>}, {pipeline_mode = #tpu.pipeline_mode<synchronous>, transform_indices = @transform_2, window_bounds = array<i64: 1, 512>}, {pipeline_mode = #tpu.pipeline_mode<synchronous>, transform_indices = @transform_3, window_bounds = array<i64: 512, 512>}, {pipeline_mode = #tpu.pipeline_mode<synchronous>, transform_indices = @transform_4, window_bounds = array<i64: 1, 512>}, {pipeline_mode = #tpu.pipeline_mode<synchronous>, transform_indices = @transform_5, window_bounds = array<i64: 512, 128>}, {pipeline_mode = #tpu.pipeline_mode<synchronous>, transform_indices = @transform_6, window_bounds = array<i64: 1, 128>}, {transform_indices = @transform_7, window_bounds = array<i64: 8, 128>}]} {
    %c0 = arith.constant 0 : index
    %c0_0 = arith.constant 0 : index
    %0 = vector.load %arg1[%c0, %c0_0] : memref<8x784xbf16, #tpu.memory_space<vmem>>, vector<8x784xbf16>
    %c0_1 = arith.constant 0 : index
    %c0_2 = arith.constant 0 : index
    %1 = vector.load %arg2[%c0_1, %c0_2] : memref<784x512xbf16, #tpu.memory_space<vmem>>, vector<784x512xbf16>
    %cst = arith.constant dense<0.000000e+00> : vector<8x512xf32>
    %2 = tpu.matmul %0, %1, %cst {dimension_numbers = #tpu.dot_dimension_numbers<[1], [0], [0], [1], [0, 0, 1, 1], [], []>} : vector<8x784xbf16>, vector<784x512xbf16>, vector<8x512xf32> -> vector<8x512xf32>
    %c0_3 = arith.constant 0 : index
    %c0_4 = arith.constant 0 : index
    %3 = vector.load %arg3[%c0_3, %c0_4] : memref<1x512xf32, #tpu.memory_space<vmem>>, vector<1x512xf32>
    %4 = vector.broadcast %3 : vector<1x512xf32> to vector<8x512xf32>
    %5 = arith.addf %2, %4 : vector<8x512xf32>
    %cst_5 = arith.constant 0.000000e+00 : f32
    %6 = vector.broadcast %cst_5 : f32 to vector<8x512xf32>
    %7 = arith.maximumf %5, %6 : vector<8x512xf32>
    %8 = arith.truncf %7 : vector<8x512xf32> to vector<8x512xbf16>
    %c0_6 = arith.constant 0 : index
    %c0_7 = arith.constant 0 : index
    %9 = vector.load %arg4[%c0_6, %c0_7] : memref<512x512xbf16, #tpu.memory_space<vmem>>, vector<512x512xbf16>
    %cst_8 = arith.constant dense<0.000000e+00> : vector<8x512xf32>
    %10 = tpu.matmul %8, %9, %cst_8 {dimension_numbers = #tpu.dot_dimension_numbers<[1], [0], [0], [1], [0, 0, 1, 1], [], []>} : vector<8x512xbf16>, vector<512x512xbf16>, vector<8x512xf32> -> vector<8x512xf32>
    %c0_9 = arith.constant 0 : index
    %c0_10 = arith.constant 0 : index
    %11 = vector.load %arg5[%c0_9, %c0_10] : memref<1x512xf32, #tpu.memory_space<vmem>>, vector<1x512xf32>
    %12 = vector.broadcast %11 : vector<1x512xf32> to vector<8x512xf32>
    %13 = arith.addf %10, %12 : vector<8x512xf32>
    %cst_11 = arith.constant 0.000000e+00 : f32
    %14 = vector.broadcast %cst_11 : f32 to vector<8x512xf32>
    %15 = arith.maximumf %13, %14 : vector<8x512xf32>
    %16 = arith.truncf %15 : vector<8x512xf32> to vector<8x512xbf16>
    %c0_12 = arith.constant 0 : index
    %c0_13 = arith.constant 0 : index
    %17 = vector.load %arg6[%c0_12, %c0_13] : memref<512x128xbf16, #tpu.memory_space<vmem>>, vector<512x128xbf16>
    %cst_14 = arith.constant dense<0.000000e+00> : vector<8x128xf32>
    %18 = tpu.matmul %16, %17, %cst_14 {dimension_numbers = #tpu.dot_dimension_numbers<[1], [0], [0], [1], [0, 0, 1, 1], [], []>} : vector<8x512xbf16>, vector<512x128xbf16>, vector<8x128xf32> -> vector<8x128xf32>
    %c0_15 = arith.constant 0 : index
    %c0_16 = arith.constant 0 : index
    %19 = vector.load %arg7[%c0_15, %c0_16] : memref<1x128xf32, #tpu.memory_space<vmem>>, vector<1x128xf32>
    %20 = vector.broadcast %19 : vector<1x128xf32> to vector<8x128xf32>
    %21 = arith.addf %18, %20 : vector<8x128xf32>
    %c0_17 = arith.constant 0 : index
    %c0_18 = arith.constant 0 : index
    %22 = vector.load %arg8[%c0_17, %c0_18] : memref<8x128xf32, #tpu.memory_space<vmem>>, vector<8x128xf32>
    tpu.vector_store %arg8[%c0_17, %c0_18], %21 {strides = array<i32>} : memref<8x128xf32, #tpu.memory_space<vmem>>, vector<8x128xf32>,
    return
  }
  func.func @transform_0(%arg0: i32) -> (i32, i32) {
    %c0_i32 = arith.constant 0 : i32
    %c0_i32_0 = arith.constant 0 : i32
    return %arg0, %c0_i32 : i32, i32
  }
  func.func @transform_1(%arg0: i32) -> (i32, i32) {
    %c0_i32 = arith.constant 0 : i32
    %c0_i32_0 = arith.constant 0 : i32
    %c0_i32_1 = arith.constant 0 : i32
    return %c0_i32, %c0_i32_0 : i32, i32
  }
  func.func @transform_2(%arg0: i32) -> (i32, i32) {
    %c0_i32 = arith.constant 0 : i32
    %c0_i32_0 = arith.constant 0 : i32
    %c0_i32_1 = arith.constant 0 : i32
    return %c0_i32, %c0_i32_0 : i32, i32
  }
  func.func @transform_3(%arg0: i32) -> (i32, i32) {
    %c0_i32 = arith.constant 0 : i32
    %c0_i32_0 = arith.constant 0 : i32
    %c0_i32_1 = arith.constant 0 : i32
    return %c0_i32, %c0_i32_0 : i32, i32
  }
  func.func @transform_4(%arg0: i32) -> (i32, i32) {
    %c0_i32 = arith.constant 0 : i32
    %c0_i32_0 = arith.constant 0 : i32
    %c0_i32_1 = arith.constant 0 : i32
    return %c0_i32, %c0_i32_0 : i32, i32
  }
  func.func @transform_5(%arg0: i32) -> (i32, i32) {
    %c0_i32 = arith.constant 0 : i32
    %c0_i32_0 = arith.constant 0 : i32
    %c0_i32_1 = arith.constant 0 : i32
    return %c0_i32, %c0_i32_0 : i32, i32
  }
  func.func @transform_6(%arg0: i32) -> (i32, i32) {
    %c0_i32 = arith.constant 0 : i32
    %c0_i32_0 = arith.constant 0 : i32
    %c0_i32_1 = arith.constant 0 : i32
    return %c0_i32, %c0_i32_0 : i32, i32
  }
  func.func @transform_7(%arg0: i32) -> (i32, i32) {
    %c0_i32 = arith.constant 0 : i32
    %c0_i32_0 = arith.constant 0 : i32
    return %arg0, %c0_i32 : i32, i32
  }
}

</mosaic_0001>

<bundles_post_ra>
// kernel: tpu_custom_call.1
= control target key start
LH: loop header
LB: loop body
LE: loop exit
PB: predicated region body
PF: predicated region fallthrough
CT: control target
= control target key end

     0   :  { %12 = vsyncpa [#allocation3], 0  ;;  %s5215_s0 = inlined_call_operand.hbm [shape: bf16[8,784], index: 0, kind: input, shape index: {}]   ;;  %s5216_s1 = inlined_call_operand.hbm [shape: bf16[784,512], index: 1, kind: input, shape index: {}]   ;;  %s5217_s2 = inlined_call_operand.hbm [shape: f32[1,512], index: 2, kind: input, shape index: {}]   ;;  %s5218_s3 = inlined_call_operand.hbm [shape: bf16[512,512], index: 3, kind: input, shape index: {}]   ;;  %s5219_s4 = inlined_call_operand.hbm [shape: f32[1,512], index: 4, kind: input, shape index: {}]   ;;  %s5220_s5 = inlined_call_operand.hbm [shape: bf16[512,128], index: 5, kind: input, shape index: {}]   ;;  %s5221_s6 = inlined_call_operand.vmem [shape: f32[1,128], index: 6, kind: input, shape index: {}]   ;;  %s5222_s7 = inlined_call_operand.hbm [shape: f32[8,128], index: 7, kind: output, shape index: {}]  }
   0x1   :  { %13 = vsyncpa [#allocation6], 0 }
   0x2   :  { %14 = vsyncpa [#allocation9], 0 }
   0x3   :  { %15 = vsyncpa [#allocation12], 0  ;;  %s32_s26 = sshll.u32 %s5216_s1, 4  ;;  %s33_s26 = int_to_ptr.hbm [resolvable:$true] %s32_s26 }
   0x4   :  { %16 = vsyncpa [#allocation4], 0  ;;  %s5007_s27 = smov [#allocation5]   ;;  %s56_s8 = sshll.u32 %s5218_s3, 4  ;;  %s57_s8 = int_to_ptr.hbm [resolvable:$true] %s56_s8 }
   0x5   :  { %s34_s28 = sshll.u32 %s5007_s27, 4  ;;  %s5008_s9 = smov 256   ;;  %s35_s28 = int_to_ptr.vmem [resolvable:$true] %s34_s28 }
   0x6   :  { %s5009_s10 = smov 16   ;;  %s5010_s11 = smov [#allocation8]  }
   0x7   :  { %40 = dma.hbm_to_vmem [thread:$0]  %s33_s26, 25088, %s35_s28, [#allocation6], %s5008_s9, %s5008_s9, %s5009_s10  }
   0x8   :  { %s58_s12 = sshll.u32 %s5010_s11, 4  ;;  %s22_s15 = sshll.u32 %s5215_s0, 4  ;;  %s59_s12 = int_to_ptr.vmem [resolvable:$true] %s58_s12  ;;  %s23_s15 = int_to_ptr.hbm [resolvable:$true] %s22_s15 }
   0x9   :  { %64 = dma.hbm_to_vmem [thread:$0]  %s57_s8, 16384, %s59_s12, [#allocation9], %s5008_s9, %s5008_s9, %s5009_s10  }
   0xa   :  { %s46_s17 = sshll.u32 %s5217_s2, 4  ;;  %s5011_s18 = smov [#allocation2]   ;;  %s47_s17 = int_to_ptr.hbm [resolvable:$true] %s46_s17 }
   0xb   :  { %s24_s19 = sshll.u32 %s5011_s18, 4  ;;  %s5012_s3 = smov [#allocation7]   ;;  %s25_s19 = int_to_ptr.vmem [resolvable:$true] %s24_s19 }
   0xc   :  { %27 = dma.hbm_to_vmem [thread:$0]  %s23_s15, 448, %s25_s19, [#allocation3]  }
   0xd   :  { %s48_s20 = sshll.u32 %s5012_s3, 4  ;;  %s70_s23 = sshll.u32 %s5219_s4, 4  ;;  %s49_s20 = int_to_ptr.vmem [resolvable:$true] %s48_s20  ;;  %s71_s23 = int_to_ptr.hbm [resolvable:$true] %s70_s23 }
   0xe   :  { %51 = dma.hbm_to_vmem [thread:$0]  %s47_s17, 64, %s49_s20, [#allocation6]  }
   0xf   :  { %s80_s25 = sshll.u32 %s5220_s5, 4  ;;  %s5013_s26 = smov [#allocation10]   ;;  %s81_s25 = int_to_ptr.hbm [resolvable:$true] %s80_s25 }
  0x10   :  { %s72_s2 = sshll.u32 %s5013_s26, 4  ;;  %s5014_s27 = smov [#allocation11]   ;;  %s73_s2 = int_to_ptr.vmem [resolvable:$true] %s72_s2 }
  0x11   :  { %75 = dma.hbm_to_vmem [thread:$0]  %s71_s23, 64, %s73_s2, [#allocation9]  }
  0x12   :  { %s82_s28 = sshll.u32 %s5014_s27, 4  ;;  %s5015_s29 = smov 64   ;;  %s83_s28 = int_to_ptr.vmem [resolvable:$true] %s82_s28 }
  0x13   :  { %s5016_s30 = smov 4  }
  0x14   :  { %88 = dma.hbm_to_vmem [thread:$0]  %s81_s25, 4096, %s83_s28, [#allocation12], %s5015_s29, %s5015_s29, %s5016_s30  }
  0x15   :  { %4997 = dma.done.wait [#allocation3], 448  }
  0x16   :  { %4998 = vsyncadd [#allocation3], 4294966848 }
  0x17   :  { %4999 = dma.done.wait [#allocation6], 25152  }
  0x18   :  { %5000 = vsyncadd [#allocation6], 4294942144 }
  0x19   :  { %5001 = dma.done.wait [#allocation9], 16448  }
  0x1a   :  { %5002 = vsyncadd [#allocation9], 4294950848 }
  0x1b   :  { %5003 = dma.done.wait [#allocation12], 4096  }
  0x1c   :  { %5004 = vsyncadd [#allocation12], 4294963200  ;;  %v3147_v0 = vld [vmem:[#allocation5 + $0xe0] sm:$0xf]  ;;  %v4491_v1 = vld [vmem:[#allocation5 + $0xec] sm:$0xf0] }
  0x1d   :  { %v3275_v2 = vld [vmem:[#allocation5 + $0x1e0] sm:$0xf]  ;;  %v3148_v3 = vor.u32 %v4491_v1, %v3147_v0  ;;  %v4523_v4 = vld [vmem:[#allocation5 + $0x1ec] sm:$0xf0]  ;;  %vm1330_vm0 = vcmask 130048   ;;  %s5017_s8 = smov [#allocation13]  }
  0x1e   :  { %v3403_v5 = vld [vmem:[#allocation5 + $0x2e0] sm:$0xf]  ;;  %v4555_v6 = vld [vmem:[#allocation5 + $0x2ec] sm:$0xf0]  ;;  %v3276_v7 = vor.u32 %v4523_v4, %v3275_v2  ;;  %s3018_s9 = sshll.u32 %s5017_s8, 4  ;;  %s3020_s12 = sshll.u32 %s5222_s7, 4  ;;  %s3019_s9 = int_to_ptr.vmem [resolvable:$true] %s3018_s9  ;;  %s3021_s12 = int_to_ptr.hbm [resolvable:$true] %s3020_s12 }
  0x1f   :  { %v3404_v8 = vor.u32 %v4555_v6, %v3403_v5  ;;  %v3531_v9 = vld [vmem:[#allocation5 + $0x3e0] sm:$0xf]  ;;  %v4587_v10 = vld [vmem:[#allocation5 + $0x3ec] sm:$0xf0]  ;;  %1334 = vmatpush.bf16.msra.mxu0 %v3148_v3 }
  0x20   :  { %v3131_v11 = vld [vmem:[#allocation5 + $0xc0] sm:$0xf]  ;;  %v3532_v12 = vor.u32 %v4587_v10, %v3531_v9  ;;  %v4487_v13 = vld [vmem:[#allocation5 + $0xcc] sm:$0xf0]  ;;  %1347 = vmatpush.bf16.msra.mxu1 %v3276_v7 }
  0x21   :  { %v3259_v14 = vld [vmem:[#allocation5 + $0x1c0] sm:$0xf]  ;;  %v4519_v15 = vld [vmem:[#allocation5 + $0x1cc] sm:$0xf0]  ;;  %1360 = vmatpush.bf16.msra.mxu2 %v3404_v8  ;;  %v3132_v16 = vor.u32 %v4487_v13, %v3131_v11 }
  0x22   :  { %v3260_v17 = vor.u32 %v4519_v15, %v3259_v14  ;;  %v3387_v18 = vld [vmem:[#allocation5 + $0x2c0] sm:$0xf]  ;;  %v4551_v19 = vld [vmem:[#allocation5 + $0x2cc] sm:$0xf0]  ;;  %1373 = vmatpush.bf16.msra.mxu3 %v3532_v12 }
  0x23   :  { %v3515_v20 = vld [vmem:[#allocation5 + $0x3c0] sm:$0xf]  ;;  %v3388_v21 = vor.u32 %v4551_v19, %v3387_v18  ;;  %v4583_v22 = vld [vmem:[#allocation5 + $0x3cc] sm:$0xf0]  ;;  %1335 = vmatpush.bf16.msra.mxu0 %v3132_v16 }
  0x24   :  { %v3115_v23 = vld [vmem:[#allocation5 + $0xa0] sm:$0xf]  ;;  %v4483_v24 = vld [vmem:[#allocation5 + $0xac] sm:$0xf0]  ;;  %v3516_v25 = vor.u32 %v4583_v22, %v3515_v20  ;;  %1348 = vmatpush.bf16.msra.mxu1 %v3260_v17 }
  0x25   :  { %v3243_v26 = vld [vmem:[#allocation5 + $0x1a0] sm:$0xf]  ;;  %v4515_v27 = vld [vmem:[#allocation5 + $0x1ac] sm:$0xf0]  ;;  %v3116_v29 = vor.u32 %v4483_v24, %v3115_v23  ;;  %1361 = vmatpush.bf16.msra.mxu2 %v3388_v21 }
  0x26   :  { %v3371_v28 = vld [vmem:[#allocation5 + $0x2a0] sm:$0xf]  ;;  %v4547_v30 = vld [vmem:[#allocation5 + $0x2ac] sm:$0xf0]  ;;  %v3244_v33 = vor.u32 %v4515_v27, %v3243_v26  ;;  %1374 = vmatpush.bf16.msra.mxu3 %v3516_v25 }
  0x27   :  { %v3499_v31 = vld [vmem:[#allocation5 + $0x3a0] sm:$0xf]  ;;  %v4579_v32 = vld [vmem:[#allocation5 + $0x3ac] sm:$0xf0]  ;;  %v3372_v34 = vor.u32 %v4547_v30, %v3371_v28  ;;  %1336 = vmatpush.bf16.msra.mxu0 %v3116_v29 }
  0x28   :  { %v3099_v35 = vld [vmem:[#allocation5 + $0x80] sm:$0xf]  ;;  %v4479_v36 = vld [vmem:[#allocation5 + $0x8c] sm:$0xf0]  ;;  %v3500_v38 = vor.u32 %v4579_v32, %v3499_v31  ;;  %1349 = vmatpush.bf16.msra.mxu1 %v3244_v33 }
  0x29   :  { %v3227_v37 = vld [vmem:[#allocation5 + $0x180] sm:$0xf]  ;;  %v4511_v39 = vld [vmem:[#allocation5 + $0x18c] sm:$0xf0]  ;;  %v3100_v44 = vor.u32 %v4479_v36, %v3099_v35  ;;  %1362 = vmatpush.bf16.msra.mxu2 %v3372_v34  ;;  %v4489_v34 = vld [vmem:[#allocation5 + $0xe4] sm:$0xf] }
  0x2a   :  { %v3355_v40 = vld [vmem:[#allocation5 + $0x280] sm:$0xf]  ;;  %v4543_v41 = vld [vmem:[#allocation5 + $0x28c] sm:$0xf0]  ;;  %v3228_v45 = vor.u32 %v4511_v39, %v3227_v37  ;;  %1375 = vmatpush.bf16.msra.mxu3 %v3500_v38  ;;  %v3149_v35 = vld [vmem:[#allocation5 + $0xf0] sm:$0xf0] }
  0x2b   :  { %v3483_v42 = vld [vmem:[#allocation5 + $0x380] sm:$0xf]  ;;  %v4575_v43 = vld [vmem:[#allocation5 + $0x38c] sm:$0xf0]  ;;  %v3356_v46 = vor.u32 %v4543_v41, %v3355_v40  ;;  %1337 = vmatpush.bf16.msra.mxu0 %v3100_v44  ;;  %v116_v37 = vld [vmem:[#allocation2] sm:$0xff] }
  0x2c   :  { %v3083_v47 = vld [vmem:[#allocation5 + $0x60] sm:$0xf]  ;;  %v4475_v48 = vld [vmem:[#allocation5 + $0x6c] sm:$0xf0]  ;;  %v3484_v50 = vor.u32 %v4575_v43, %v3483_v42  ;;  %1350 = vmatpush.bf16.msra.mxu1 %v3228_v45  ;;  %v330_v41 = vunpack.c.l.b16 %v116_v37 }
  0x2d   :  { %v3211_v49 = vld [vmem:[#allocation5 + $0x160] sm:$0xf]  ;;  %v4507_v51 = vld [vmem:[#allocation5 + $0x16c] sm:$0xf0]  ;;  %v3084_v56 = vor.u32 %v4475_v48, %v3083_v47  ;;  %1363 = vmatpush.bf16.msra.mxu2 %v3356_v46  ;;  %v4521_v46 = vld [vmem:[#allocation5 + $0x1e4] sm:$0xf] }
  0x2e   :  { %v3339_v52 = vld [vmem:[#allocation5 + $0x260] sm:$0xf]  ;;  %v4539_v53 = vld [vmem:[#allocation5 + $0x26c] sm:$0xf0]  ;;  %v3212_v57 = vor.u32 %v4507_v51, %v3211_v49  ;;  %1376 = vmatpush.bf16.msra.mxu3 %v3484_v50  ;;  %v3277_v47 = vld [vmem:[#allocation5 + $0x1f0] sm:$0xf0]  ;;  %v3152_v49 = vor.u32 %v4489_v34, %v3149_v35 }
  0x2f   :  { %v3467_v54 = vld [vmem:[#allocation5 + $0x360] sm:$0xf]  ;;  %v4571_v55 = vld [vmem:[#allocation5 + $0x36c] sm:$0xf0]  ;;  %v3340_v58 = vor.u32 %v4539_v53, %v3339_v52  ;;  %1338 = vmatpush.bf16.msra.mxu0 %v3084_v56  ;;  %v3133_v56 = vld [vmem:[#allocation5 + $0xd0] sm:$0xf0] }
  0x30   :  { %v3067_v59 = vld [vmem:[#allocation5 + $0x40] sm:$0xf]  ;;  %v4471_v60 = vld [vmem:[#allocation5 + $0x4c] sm:$0xf0]  ;;  %v3468_v62 = vor.u32 %v4571_v55, %v3467_v54  ;;  %1351 = vmatpush.bf16.msra.mxu1 %v3212_v57  ;;  %v4485_v55 = vld [vmem:[#allocation5 + $0xc4] sm:$0xf]  ;;  %v5078_v57 = vpack.c.b16 %v330_v41, %v330_v41 }
  0x31   :  { %v3195_v61 = vld [vmem:[#allocation5 + $0x140] sm:$0xf]  ;;  %v4503_v63 = vld [vmem:[#allocation5 + $0x14c] sm:$0xf0]  ;;  %v3068_v4 = vor.u32 %v4471_v60, %v3067_v59  ;;  %1364 = vmatpush.bf16.msra.mxu2 %v3340_v58  ;;  %v331_v58 = vunpack.c.h.b16 %v116_v37  ;;  %v3085_v34 = vld [vmem:[#allocation5 + $0x70] sm:$0xf0] }
  0x32   :  { %v3323_v0 = vld [vmem:[#allocation5 + $0x240] sm:$0xf]  ;;  %v4535_v1 = vld [vmem:[#allocation5 + $0x24c] sm:$0xf0]  ;;  %v3196_v5 = vor.u32 %v4503_v63, %v3195_v61  ;;  %1377 = vmatpush.bf16.msra.mxu3 %v3468_v62  ;;  %v3280_v61 = vor.u32 %v4521_v46, %v3277_v47  ;;  %v4517_v63 = vld [vmem:[#allocation5 + $0x1c4] sm:$0xf] }
  0x33   :  { %v3451_v2 = vld [vmem:[#allocation5 + $0x340] sm:$0xf]  ;;  %v4567_v3 = vld [vmem:[#allocation5 + $0x34c] sm:$0xf0]  ;;  %v3324_v6 = vor.u32 %v4535_v1, %v3323_v0  ;;  %1339 = vmatpush.bf16.msra.mxu0 %v3068_v4  ;;  %v3261_v0 = vld [vmem:[#allocation5 + $0x1d0] sm:$0xf0] }
  0x34   :  { %v3051_v7 = vld [vmem:[#allocation5 + $0x20] sm:$0xf]  ;;  %v4467_v8 = vld [vmem:[#allocation5 + $0x2c] sm:$0xf0]  ;;  %v3452_v10 = vor.u32 %v4567_v3, %v3451_v2  ;;  %1352 = vmatpush.bf16.msra.mxu1 %v3196_v5  ;;  %v3136_v2 = vor.u32 %v4485_v55, %v3133_v56  ;;  %v4469_v46 = vld [vmem:[#allocation5 + $0x44] sm:$0xf] }
  0x35   :  { %v3179_v9 = vld [vmem:[#allocation5 + $0x120] sm:$0xf]  ;;  %v4499_v11 = vld [vmem:[#allocation5 + $0x12c] sm:$0xf0]  ;;  %v3052_v17 = vor.u32 %v4467_v8, %v3051_v7  ;;  %1365 = vmatpush.bf16.msra.mxu2 %v3324_v6  ;;  %v4481_v7 = vld [vmem:[#allocation5 + $0xa4] sm:$0xf] }
  0x36   :  { %v3307_v12 = vld [vmem:[#allocation5 + $0x220] sm:$0xf]  ;;  %v4531_v13 = vld [vmem:[#allocation5 + $0x22c] sm:$0xf0]  ;;  %v3180_v21 = vor.u32 %v4499_v11, %v3179_v9  ;;  %1378 = vmatpush.bf16.msra.mxu3 %v3452_v10  ;;  %v3117_v8 = vld [vmem:[#allocation5 + $0xb0] sm:$0xf0]  ;;  %v5084_v9 = vpack.c.b16 %v331_v58, %v331_v58  ;;  %v3264_v10 = vor.u32 %v4517_v63, %v3261_v0 }
  0x37   :  { %v3435_v14 = vld [vmem:[#allocation5 + $0x320] sm:$0xf]  ;;  %v4563_v15 = vld [vmem:[#allocation5 + $0x32c] sm:$0xf0]  ;;  %v3308_v22 = vor.u32 %v4531_v13, %v3307_v12  ;;  %1340 = vmatpush.bf16.msra.mxu0 %v3052_v17  ;;  %v4513_v12 = vld [vmem:[#allocation5 + $0x1a4] sm:$0xf] }
  0x38   :  { %v3035_v16 = vld [vmem:[#allocation5] sm:$0xf]  ;;  %v4463_v18 = vld [vmem:[#allocation5 + $0xc] sm:$0xf0]  ;;  %v3436_v26 = vor.u32 %v4563_v15, %v3435_v14  ;;  %1353 = vmatpush.bf16.msra.mxu1 %v3180_v21  ;;  %v3245_v13 = vld [vmem:[#allocation5 + $0x1b0] sm:$0xf0]  ;;  %v3120_v15 = vor.u32 %v4481_v7, %v3117_v8 }
  0x39   :  { %v3163_v19 = vld [vmem:[#allocation5 + $0x100] sm:$0xf]  ;;  %v4495_v20 = vld [vmem:[#allocation5 + $0x10c] sm:$0xf0]  ;;  %v3036_v33 = vor.u32 %v4463_v18, %v3035_v16  ;;  %1366 = vmatpush.bf16.msra.mxu2 %v3308_v22  ;;  %v3101_v21 = vld [vmem:[#allocation5 + $0x90] sm:$0xf0] }
  0x3a   :  { %v3291_v23 = vld [vmem:[#allocation5 + $0x200] sm:$0xf]  ;;  %v4527_v24 = vld [vmem:[#allocation5 + $0x20c] sm:$0xf0]  ;;  %v3164_v38 = vor.u32 %v4495_v20, %v3163_v19  ;;  %1379 = vmatpush.bf16.msra.mxu3 %v3436_v26  ;;  %v4477_v20 = vld [vmem:[#allocation5 + $0x84] sm:$0xf] }
  0x3b   :  { %v117_v25 = vld [vmem:[#allocation2 + $0x8] sm:$0xff]  ;;  %v3419_v27 = vld [vmem:[#allocation5 + $0x300] sm:$0xf]  ;;  %v3292_v39 = vor.u32 %v4527_v24, %v3291_v23  ;;  %1341 = vmatpush.bf16.msra.mxu0 %v3036_v33  ;;  %v119_v22 = vld [vmem:[#allocation2 + $0x18] sm:$0xf]  ;;  %v3248_v23 = vor.u32 %v4513_v12, %v3245_v13 }
  0x3c   :  { %v4559_v28 = vld [vmem:[#allocation5 + $0x30c] sm:$0xf0]  ;;  %v3659_v29 = vld [vmem:[#allocation5 + $0x4e0] sm:$0xf]  ;;  %v332_v36 = vunpack.c.l.b16 %v117_v25  ;;  %v333_v42 = vunpack.c.h.b16 %v117_v25  ;;  %1354 = vmatpush.bf16.msra.mxu1 %v3164_v38  ;;  %v4509_v25 = vld [vmem:[#allocation5 + $0x184] sm:$0xf]  ;;  %v336_v35 = vunpack.c.l.b16 %v119_v22 }
  0x3d   :  { %v4619_v30 = vld [vmem:[#allocation5 + $0x4ec] sm:$0xf0]  ;;  %v3787_v31 = vld [vmem:[#allocation5 + $0x5e0] sm:$0xf]  ;;  %v3420_v43 = vor.u32 %v4559_v28, %v3419_v27  ;;  %1367 = vmatpush.bf16.msra.mxu2 %v3292_v39  ;;  %v3229_v26 = vld [vmem:[#allocation5 + $0x190] sm:$0xf0]  ;;  %v3104_v28 = vor.u32 %v4477_v20, %v3101_v21 }
  0x3e   :  { %v4651_v32 = vld [vmem:[#allocation5 + $0x5ec] sm:$0xf0]  ;;  %v3803_v40 = vld [vmem:[#allocation5 + $0x600] sm:$0xf]  ;;  %v3660_v44 = vor.u32 %v4619_v30, %v3659_v29  ;;  %v5076_v53 = vpack.c.b16 %v332_v36, %v332_v36  ;;  %v5080_v60 = vpack.c.b16 %v333_v42, %v333_v42  ;;  %1342 = vmatmul.bf16.vlgmr.msra.gmra.mxu0 %v5078_v57  ;;  %v4473_v33 = vld [vmem:[#allocation5 + $0x64] sm:$0xf]  ;;  %v3232_v36 = vor.u32 %v4509_v25, %v3229_v26 }
  0x3f   :  { %v4655_v45 = vld [vmem:[#allocation5 + $0x60c] sm:$0xf0]  ;;  %v3788_v48 = vor.u32 %v4651_v32, %v3787_v31  ;;  %v3643_v50 = vld [vmem:[#allocation5 + $0x4c0] sm:$0xf]  ;;  %1380 = vmatpush.bf16.msra.mxu3 %v3420_v43  ;;  %1355 = vmatmul.bf16.vlgmr.msra.gmra.mxu1 %v5084_v9  ;;  %v4505_v38 = vld [vmem:[#allocation5 + $0x164] sm:$0xf]  ;;  %v3088_v41 = vor.u32 %v4473_v33, %v3085_v34 }
  0x40   :  { %v4615_v51 = vld [vmem:[#allocation5 + $0x4cc] sm:$0xf0]  ;;  %v3771_v52 = vld [vmem:[#allocation5 + $0x5c0] sm:$0xf]  ;;  %v3804_v59 = vor.u32 %v4655_v45, %v3803_v40  ;;  %1386 = vmatpush.bf16.msrb.mxu0 %v3660_v44  ;;  %1368 = vmatmul.bf16.vlgmr.msra.gmra.mxu2 %v5076_v53  ;;  %v3213_v39 = vld [vmem:[#allocation5 + $0x170] sm:$0xf0] }
  0x41   :  { %v4647_v54 = vld [vmem:[#allocation5 + $0x5cc] sm:$0xf0]  ;;  %v3644_v62 = vor.u32 %v4615_v51, %v3643_v50  ;;  %1399 = vmatpush.bf16.msrb.mxu1 %v3788_v48  ;;  %v3627_v3 = vld [vmem:[#allocation5 + $0x4a0] sm:$0xf]  ;;  %v3069_v47 = vld [vmem:[#allocation5 + $0x50] sm:$0xf0]  ;;  %v5088_v48 = vpack.c.b16 %v336_v35, %v336_v35 }
  0x42   :  { %v3772_v1 = vor.u32 %v4647_v54, %v3771_v52  ;;  %v4611_v4 = vld [vmem:[#allocation5 + $0x4ac] sm:$0xf0]  ;;  %v3755_v5 = vld [vmem:[#allocation5 + $0x5a0] sm:$0xf]  ;;  %1419 = vmatpush.bf16.msrb.mxu2 %v3804_v59  ;;  %1381 = vmatmul.bf16.vlgmr.msra.gmra.mxu3 %v5080_v60  ;;  %v4501_v51 = vld [vmem:[#allocation5 + $0x144] sm:$0xf]  ;;  %v3072_v55 = vor.u32 %v4469_v46, %v3069_v47 }
  0x43   :  { %1425 = vmatpush.bf16.msrb.mxu3 %v3152_v49  ;;  %v4643_v6 = vld [vmem:[#allocation5 + $0x5ac] sm:$0xf0]  ;;  %v3628_v11 = vor.u32 %v4611_v4, %v3627_v3  ;;  %v3611_v16 = vld [vmem:[#allocation5 + $0x480] sm:$0xf]  ;;  %v3216_v49 = vor.u32 %v4505_v38, %v3213_v39  ;;  %v3197_v52 = vld [vmem:[#allocation5 + $0x150] sm:$0xf0] }
  0x44   :  { %1387 = vmatpush.bf16.msrb.mxu0 %v3644_v62  ;;  %v3756_v14 = vor.u32 %v4643_v6, %v3755_v5  ;;  %v4607_v17 = vld [vmem:[#allocation5 + $0x48c] sm:$0xf0]  ;;  %v3739_v18 = vld [vmem:[#allocation5 + $0x580] sm:$0xf]  ;;  %v4465_v62 = vld [vmem:[#allocation5 + $0x24] sm:$0xf] }
  0x45   :  { %1400 = vmatpush.bf16.msrb.mxu1 %v3772_v1  ;;  %v4639_v19 = vld [vmem:[#allocation5 + $0x58c] sm:$0xf0]  ;;  %v3612_v24 = vor.u32 %v4607_v17, %v3611_v16  ;;  %v3595_v29 = vld [vmem:[#allocation5 + $0x460] sm:$0xf]  ;;  %v3053_v63 = vld [vmem:[#allocation5 + $0x30] sm:$0xf0]  ;;  %v3200_v1 = vor.u32 %v4501_v51, %v3197_v52 }
  0x46   :  { %1438 = vmatpush.bf16.msra.mxu2 %v3280_v61  ;;  %v3740_v27 = vor.u32 %v4639_v19, %v3739_v18  ;;  %v4603_v30 = vld [vmem:[#allocation5 + $0x46c] sm:$0xf0]  ;;  %v3723_v31 = vld [vmem:[#allocation5 + $0x560] sm:$0xf]  ;;  %v4497_v0 = vld [vmem:[#allocation5 + $0x124] sm:$0xf]  ;;  %v3056_v7 = vor.u32 %v4465_v62, %v3053_v63 }
  0x47   :  { %1426 = vmatpush.bf16.msrb.mxu3 %v3136_v2  ;;  %v4635_v32 = vld [vmem:[#allocation5 + $0x56c] sm:$0xf0]  ;;  %v3596_v37 = vor.u32 %v4603_v30, %v3595_v29  ;;  %v3579_v42 = vld [vmem:[#allocation5 + $0x440] sm:$0xf]  ;;  %v3181_v3 = vld [vmem:[#allocation5 + $0x130] sm:$0xf0] }
  0x48   :  { %1388 = vmatpush.bf16.msrb.mxu0 %v3628_v11  ;;  %v3724_v40 = vor.u32 %v4635_v32, %v3723_v31  ;;  %v4599_v43 = vld [vmem:[#allocation5 + $0x44c] sm:$0xf0]  ;;  %v3707_v44 = vld [vmem:[#allocation5 + $0x540] sm:$0xf]  ;;  %v118_v5 = vld [vmem:[#allocation2 + $0x10] sm:$0xff]  ;;  %v3184_v19 = vor.u32 %v4497_v0, %v3181_v3 }
  0x49   :  { %1401 = vmatpush.bf16.msrb.mxu1 %v3756_v14  ;;  %v4631_v45 = vld [vmem:[#allocation5 + $0x54c] sm:$0xf0]  ;;  %v3580_v50 = vor.u32 %v4599_v43, %v3579_v42  ;;  %v3563_v56 = vld [vmem:[#allocation5 + $0x420] sm:$0xf]  ;;  %v4461_v12 = vld [vmem:[#allocation5 + $0x4] sm:$0xf]  ;;  %v334_v18 = vunpack.c.l.b16 %v118_v5 }
  0x4a   :  { %1439 = vmatpush.bf16.msra.mxu2 %v3264_v10  ;;  %v3708_v54 = vor.u32 %v4631_v45, %v3707_v44  ;;  %v4595_v58 = vld [vmem:[#allocation5 + $0x42c] sm:$0xf0]  ;;  %v3691_v59 = vld [vmem:[#allocation5 + $0x520] sm:$0xf]  ;;  %v3037_v13 = vld [vmem:[#allocation5 + $0x10] sm:$0xf0] }
  0x4b   :  { %1427 = vmatpush.bf16.msrb.mxu3 %v3120_v15  ;;  %v4627_v61 = vld [vmem:[#allocation5 + $0x52c] sm:$0xf0]  ;;  %v3564_v2 = vor.u32 %v4595_v58, %v3563_v56  ;;  %v3547_v4 = vld [vmem:[#allocation5 + $0x400] sm:$0xf]  ;;  %v4553_v14 = vld [vmem:[#allocation5 + $0x2e4] sm:$0xf]  ;;  %v3040_v25 = vor.u32 %v4461_v12, %v3037_v13  ;;  %v5092_v34 = vpack.c.b16 %v334_v18, %v334_v18 }
  0x4c   :  { %1389 = vmatpush.bf16.msrb.mxu0 %v3612_v24  ;;  %v3692_v6 = vor.u32 %v4627_v61, %v3691_v59  ;;  %v4591_v8 = vld [vmem:[#allocation5 + $0x40c] sm:$0xf0]  ;;  %v3675_v10 = vld [vmem:[#allocation5 + $0x500] sm:$0xf]  ;;  %v3405_v15 = vld [vmem:[#allocation5 + $0x2f0] sm:$0xf0] }
  0x4d   :  { %1402 = vmatpush.bf16.msrb.mxu1 %v3740_v27  ;;  %v4623_v11 = vld [vmem:[#allocation5 + $0x50c] sm:$0xf0]  ;;  %v4585_v16 = vld [vmem:[#allocation5 + $0x3e4] sm:$0xf]  ;;  %v3533_v17 = vld [vmem:[#allocation5 + $0x3f0] sm:$0xf0]  ;;  %v3548_v20 = vor.u32 %v4591_v8, %v3547_v4 }
  0x4e   :  { %1440 = vmatpush.bf16.msra.mxu2 %v3248_v23  ;;  %v4617_v21 = vld [vmem:[#allocation5 + $0x4e4] sm:$0xf]  ;;  %v3661_v22 = vld [vmem:[#allocation5 + $0x4f0] sm:$0xf0]  ;;  %v335_v23 = vunpack.c.h.b16 %v118_v5  ;;  %v3676_v24 = vor.u32 %v4623_v11, %v3675_v10  ;;  %v3536_v29 = vor.u32 %v4585_v16, %v3533_v17 }
  0x4f   :  { %1428 = vmatpush.bf16.msrb.mxu3 %v3104_v28  ;;  %v4493_v26 = vld [vmem:[#allocation5 + $0x104] sm:$0xf]  ;;  %v3165_v27 = vld [vmem:[#allocation5 + $0x110] sm:$0xf0]  ;;  %v3408_v28 = vor.u32 %v4553_v14, %v3405_v15  ;;  %v3664_v33 = vor.u32 %v4617_v21, %v3661_v22 }
  0x50   :  { %1390 = vmatpush.bf16.msrb.mxu0 %v3596_v37  ;;  %3817 = vmatmul.msk.bf16.vlgmr.msrb.gmra.mxu2 %vm1330_vm0, %v5088_v48  ;;  %v4649_v30 = vld [vmem:[#allocation5 + $0x5e4] sm:$0xf]  ;;  %v3789_v31 = vld [vmem:[#allocation5 + $0x5f0] sm:$0xf0]  ;;  %v3168_v38 = vor.u32 %v4493_v26, %v3165_v27  ;;  %v5094_v39 = vpack.c.b16 %v335_v23, %v335_v23 }
  0x51   :  { %1403 = vmatpush.bf16.msrb.mxu1 %v3724_v40  ;;  %v4549_v32 = vld [vmem:[#allocation5 + $0x2c4] sm:$0xf]  ;;  %v3389_v35 = vld [vmem:[#allocation5 + $0x2d0] sm:$0xf0]  ;;  %v3792_v42 = vor.u32 %v4649_v30, %v3789_v31 }
  0x52   :  { %1441 = vmatpush.bf16.msra.mxu2 %v3232_v36  ;;  %v4581_v36 = vld [vmem:[#allocation5 + $0x3c4] sm:$0xf]  ;;  %v3517_v37 = vld [vmem:[#allocation5 + $0x3d0] sm:$0xf0]  ;;  %v3392_v43 = vor.u32 %v4549_v32, %v3389_v35 }
  0x53   :  { %1429 = vmatpush.bf16.msrb.mxu3 %v3088_v41  ;;  %v4613_v40 = vld [vmem:[#allocation5 + $0x4c4] sm:$0xf]  ;;  %v3645_v41 = vld [vmem:[#allocation5 + $0x4d0] sm:$0xf0]  ;;  %v3520_v44 = vor.u32 %v4581_v36, %v3517_v37 }
  0x54   :  { %1391 = vmatpush.bf16.msrb.mxu0 %v3580_v50  ;;  %v4645_v45 = vld [vmem:[#allocation5 + $0x5c4] sm:$0xf]  ;;  %v3773_v46 = vld [vmem:[#allocation5 + $0x5d0] sm:$0xf0] }
  0x55   :  { %1404 = vmatpush.bf16.msrb.mxu1 %v3708_v54  ;;  %v4545_v47 = vld [vmem:[#allocation5 + $0x2a4] sm:$0xf]  ;;  %v3373_v50 = vld [vmem:[#allocation5 + $0x2b0] sm:$0xf0]  ;;  %v3776_v56 = vor.u32 %v4645_v45, %v3773_v46 }
  0x56   :  { %1442 = vmatpush.bf16.msra.mxu2 %v3216_v49  ;;  %v3648_v49 = vor.u32 %v4613_v40, %v3645_v41  ;;  %v4577_v51 = vld [vmem:[#allocation5 + $0x3a4] sm:$0xf]  ;;  %v3501_v52 = vld [vmem:[#allocation5 + $0x3b0] sm:$0xf0]  ;;  %v3376_v58 = vor.u32 %v4545_v47, %v3373_v50 }
  0x57   :  { %1430 = vmatpush.bf16.msrb.mxu3 %v3072_v55  ;;  %v4609_v54 = vld [vmem:[#allocation5 + $0x4a4] sm:$0xf]  ;;  %v3629_v55 = vld [vmem:[#allocation5 + $0x4b0] sm:$0xf0]  ;;  %v3504_v59 = vor.u32 %v4577_v51, %v3501_v52 }
  0x58   :  { %1392 = vmatpush.bf16.msrb.mxu0 %v3564_v2  ;;  %v4641_v61 = vld [vmem:[#allocation5 + $0x5a4] sm:$0xf]  ;;  %v3757_v62 = vld [vmem:[#allocation5 + $0x5b0] sm:$0xf0]  ;;  %v3632_v0 = vor.u32 %v4609_v54, %v3629_v55 }
  0x59   :  { %1405 = vmatpush.bf16.msrb.mxu1 %v3692_v6  ;;  %v4541_v63 = vld [vmem:[#allocation5 + $0x284] sm:$0xf]  ;;  %v3485_v3 = vld [vmem:[#allocation5 + $0x390] sm:$0xf0]  ;;  %v3760_v6 = vor.u32 %v4641_v61, %v3757_v62  ;;  %v3155_v61 = vld [vmem:[#allocation5 + $0xe8] sm:$0xf] }
  0x5a   :  { %1443 = vmatpush.bf16.msra.mxu2 %v3200_v1  ;;  %v3357_v1 = vld [vmem:[#allocation5 + $0x290] sm:$0xf0]  ;;  %v4573_v2 = vld [vmem:[#allocation5 + $0x384] sm:$0xf]  ;;  %v4492_v62 = vld [vmem:[#allocation5 + $0xf4] sm:$0xf0] }
  0x5b   :  { %1431 = vmatpush.bf16.msrb.mxu3 %v3056_v7  ;;  %v4605_v4 = vld [vmem:[#allocation5 + $0x484] sm:$0xf]  ;;  %v3613_v5 = vld [vmem:[#allocation5 + $0x490] sm:$0xf0]  ;;  %v3360_v7 = vor.u32 %v4541_v63, %v3357_v1  ;;  %v3488_v8 = vor.u32 %v4573_v2, %v3485_v3  ;;  %v3411_v2 = vld [vmem:[#allocation5 + $0x2e8] sm:$0xf] }
  0x5c   :  { %1393 = vmatpush.bf16.msrb.mxu0 %v3548_v20  ;;  %v4637_v10 = vld [vmem:[#allocation5 + $0x584] sm:$0xf]  ;;  %v3741_v11 = vld [vmem:[#allocation5 + $0x590] sm:$0xf0]  ;;  %v3616_v13 = vor.u32 %v4605_v4, %v3613_v5  ;;  %v4556_v3 = vld [vmem:[#allocation5 + $0x2f4] sm:$0xf0] }
  0x5d   :  { %1406 = vmatpush.bf16.msrb.mxu1 %v3676_v24  ;;  %v4537_v12 = vld [vmem:[#allocation5 + $0x264] sm:$0xf]  ;;  %v3341_v14 = vld [vmem:[#allocation5 + $0x270] sm:$0xf0] }
  0x5e   :  { %1444 = vmatpush.bf16.msra.mxu2 %v3184_v19  ;;  %v4569_v15 = vld [vmem:[#allocation5 + $0x364] sm:$0xf]  ;;  %v3469_v16 = vld [vmem:[#allocation5 + $0x370] sm:$0xf0]  ;;  %v3744_v19 = vor.u32 %v4637_v10, %v3741_v11  ;;  %v3344_v20 = vor.u32 %v4537_v12, %v3341_v14  ;;  %v3156_v10 = vor.u32 %v4492_v62, %v3155_v61  ;;  %v3539_v11 = vld [vmem:[#allocation5 + $0x3e8] sm:$0xf] }
  0x5f   :  { %1432 = vmatpush.bf16.msrb.mxu3 %v3040_v25  ;;  %1394 = vmatmul.bf16.vlgmr.msrb.gmra.mxu0 %v5092_v34  ;;  %v4601_v17 = vld [vmem:[#allocation5 + $0x464] sm:$0xf]  ;;  %v3597_v18 = vld [vmem:[#allocation5 + $0x470] sm:$0xf0]  ;;  %v3472_v21 = vor.u32 %v4569_v15, %v3469_v16  ;;  %v4588_v12 = vld [vmem:[#allocation5 + $0x3f4] sm:$0xf0]  ;;  %v3412_v16 = vor.u32 %v4556_v3, %v3411_v2 }
  0x60   :  { %1451 = vmatpush.bf16.msra.mxu0 %v3408_v28  ;;  %1407 = vmatmul.bf16.vlgmr.msrb.gmra.mxu1 %v5094_v39  ;;  %v4633_v22 = vld [vmem:[#allocation5 + $0x564] sm:$0xf]  ;;  %v3725_v23 = vld [vmem:[#allocation5 + $0x570] sm:$0xf0]  ;;  %v3600_v25 = vor.u32 %v4601_v17, %v3597_v18  ;;  %v3283_v14 = vld [vmem:[#allocation5 + $0x1e8] sm:$0xf] }
  0x61   :  { %1464 = vmatpush.bf16.msra.mxu1 %v3536_v29  ;;  %v4533_v24 = vld [vmem:[#allocation5 + $0x244] sm:$0xf]  ;;  %v3325_v26 = vld [vmem:[#allocation5 + $0x250] sm:$0xf0]  ;;  %v3728_v31 = vor.u32 %v4633_v22, %v3725_v23  ;;  %v4524_v15 = vld [vmem:[#allocation5 + $0x1f4] sm:$0xf0] }
  0x62   :  { %1445 = vmatpush.bf16.msra.mxu2 %v3168_v38  ;;  %1433 = vmatmul.bf16.vlgmr.msrb.gmra.mxu3 %v5078_v57  ;;  %v4565_v27 = vld [vmem:[#allocation5 + $0x344] sm:$0xf]  ;;  %v3453_v28 = vld [vmem:[#allocation5 + $0x350] sm:$0xf0]  ;;  %v3139_v18 = vld [vmem:[#allocation5 + $0xc8] sm:$0xf]  ;;  %v3284_v23 = vor.u32 %v4524_v15, %v3283_v14 }
  0x63   :  { %1477 = vmatpush.bf16.msra.mxu3 %v3664_v33  ;;  %v4597_v29 = vld [vmem:[#allocation5 + $0x444] sm:$0xf]  ;;  %v3581_v30 = vld [vmem:[#allocation5 + $0x450] sm:$0xf0]  ;;  %v3328_v33 = vor.u32 %v4533_v24, %v3325_v26  ;;  %v3456_v35 = vor.u32 %v4565_v27, %v3453_v28  ;;  %v4552_v22 = vld [vmem:[#allocation5 + $0x2d4] sm:$0xf0] }
  0x64   :  { %1452 = vmatpush.bf16.msra.mxu0 %v3392_v43  ;;  %v4629_v32 = vld [vmem:[#allocation5 + $0x544] sm:$0xf]  ;;  %v3709_v36 = vld [vmem:[#allocation5 + $0x550] sm:$0xf0]  ;;  %v3584_v40 = vor.u32 %v4597_v29, %v3581_v30  ;;  %v3523_v24 = vld [vmem:[#allocation5 + $0x3c8] sm:$0xf] }
  0x65   :  { %1465 = vmatpush.bf16.msra.mxu1 %v3520_v44  ;;  %1446 = vmatmul.bf16.vlgmr.msra.gmra.mxu2 %v5084_v9  ;;  %v4529_v37 = vld [vmem:[#allocation5 + $0x224] sm:$0xf]  ;;  %v3309_v38 = vld [vmem:[#allocation5 + $0x230] sm:$0xf0]  ;;  %v3712_v45 = vor.u32 %v4629_v32, %v3709_v36  ;;  %v3267_v27 = vld [vmem:[#allocation5 + $0x1c8] sm:$0xf] }
  0x66   :  { %1490 = vmatpush.bf16.msrb.mxu2 %v3792_v42  ;;  %v4561_v41 = vld [vmem:[#allocation5 + $0x324] sm:$0xf]  ;;  %v3437_v42 = vld [vmem:[#allocation5 + $0x330] sm:$0xf0]  ;;  %v4520_v28 = vld [vmem:[#allocation5 + $0x1d4] sm:$0xf0] }
  0x67   :  { %1478 = vmatpush.bf16.msra.mxu3 %v3648_v49  ;;  %v4593_v43 = vld [vmem:[#allocation5 + $0x424] sm:$0xf]  ;;  %v3565_v44 = vld [vmem:[#allocation5 + $0x430] sm:$0xf0]  ;;  %v3312_v49 = vor.u32 %v4529_v37, %v3309_v38  ;;  %v3440_v50 = vor.u32 %v4561_v41, %v3437_v42  ;;  %v3123_v30 = vld [vmem:[#allocation5 + $0xa8] sm:$0xf]  ;;  %v3268_v36 = vor.u32 %v4520_v28, %v3267_v27 }
  0x68   :  { %1453 = vmatpush.bf16.msra.mxu0 %v3376_v58  ;;  %v4625_v46 = vld [vmem:[#allocation5 + $0x524] sm:$0xf]  ;;  %v3693_v47 = vld [vmem:[#allocation5 + $0x530] sm:$0xf0]  ;;  %v3568_v55 = vor.u32 %v4593_v43, %v3565_v44  ;;  %v3507_v37 = vld [vmem:[#allocation5 + $0x3a8] sm:$0xf] }
  0x69   :  { %1466 = vmatpush.bf16.msra.mxu1 %v3504_v59  ;;  %v4525_v51 = vld [vmem:[#allocation5 + $0x204] sm:$0xf]  ;;  %v3293_v52 = vld [vmem:[#allocation5 + $0x210] sm:$0xf0]  ;;  %v4580_v38 = vld [vmem:[#allocation5 + $0x3b4] sm:$0xf0] }
  0x6a   :  { %1491 = vmatpush.bf16.msrb.mxu2 %v3776_v56  ;;  %v4557_v54 = vld [vmem:[#allocation5 + $0x304] sm:$0xf]  ;;  %v3421_v56 = vld [vmem:[#allocation5 + $0x310] sm:$0xf0]  ;;  %v3296_v4 = vor.u32 %v4525_v51, %v3293_v52  ;;  %v3251_v41 = vld [vmem:[#allocation5 + $0x1a8] sm:$0xf] }
  0x6b   :  { %1479 = vmatpush.bf16.msra.mxu3 %v3632_v0  ;;  %v4589_v58 = vld [vmem:[#allocation5 + $0x404] sm:$0xf]  ;;  %v3549_v59 = vld [vmem:[#allocation5 + $0x410] sm:$0xf0]  ;;  %v3696_v0 = vor.u32 %v4625_v46, %v3693_v47  ;;  %v3424_v5 = vor.u32 %v4557_v54, %v3421_v56  ;;  %v4516_v42 = vld [vmem:[#allocation5 + $0x1b4] sm:$0xf0]  ;;  %v3508_v46 = vor.u32 %v4580_v38, %v3507_v37 }
  0x6c   :  { %1454 = vmatpush.bf16.msra.mxu0 %v3360_v7  ;;  %v4653_v63 = vld [vmem:[#allocation5 + $0x604] sm:$0xf]  ;;  %v3805_v1 = vld [vmem:[#allocation5 + $0x610] sm:$0xf0]  ;;  %v3107_v44 = vld [vmem:[#allocation5 + $0x88] sm:$0xf] }
  0x6d   :  { %1467 = vmatpush.bf16.msra.mxu1 %v3488_v8  ;;  %v3677_v7 = vld [vmem:[#allocation5 + $0x510] sm:$0xf0]  ;;  %v3552_v8 = vor.u32 %v4589_v58, %v3549_v59  ;;  %v3363_v47 = vld [vmem:[#allocation5 + $0x288] sm:$0xf]  ;;  %v4576_v52 = vld [vmem:[#allocation5 + $0x394] sm:$0xf0] }
  0x6e   :  { %1492 = vmatpush.bf16.msrb.mxu2 %v3760_v6  ;;  %v4621_v6 = vld [vmem:[#allocation5 + $0x504] sm:$0xf]  ;;  %v3491_v51 = vld [vmem:[#allocation5 + $0x388] sm:$0xf]  ;;  %v4512_v56 = vld [vmem:[#allocation5 + $0x194] sm:$0xf0] }
  0x6f   :  { %1480 = vmatpush.bf16.msra.mxu3 %v3616_v13  ;;  %v3808_v13 = vor.u32 %v4653_v63, %v3805_v1  ;;  %v3680_v17 = vor.u32 %v4621_v6, %v3677_v7  ;;  %v3091_v59 = vld [vmem:[#allocation5 + $0x68] sm:$0xf]  ;;  %v4476_v61 = vld [vmem:[#allocation5 + $0x74] sm:$0xf0]  ;;  %v3492_v62 = vor.u32 %v4576_v52, %v3491_v51  ;;  %v4490_v51 = vld [vmem:[#allocation5 + $0xec] sm:$0xf] }
  0x70   :  { %1455 = vmatpush.bf16.msra.mxu0 %v3344_v20  ;;  %v3540_v20 = vor.u32 %v4588_v12, %v3539_v11  ;;  %v3347_v63 = vld [vmem:[#allocation5 + $0x268] sm:$0xf]  ;;  %v4572_v3 = vld [vmem:[#allocation5 + $0x374] sm:$0xf0]  ;;  %v3157_v52 = vld [vmem:[#allocation5 + $0xf8] sm:$0xf0] }
  0x71   :  { %1468 = vmatpush.bf16.msra.mxu1 %v3472_v21  ;;  %v3395_v21 = vld [vmem:[#allocation5 + $0x2c8] sm:$0xf]  ;;  %v4508_v6 = vld [vmem:[#allocation5 + $0x174] sm:$0xf0] }
  0x72   :  { %1493 = vmatpush.bf16.msrb.mxu2 %v3744_v19  ;;  %v4488_v19 = vld [vmem:[#allocation5 + $0xd4] sm:$0xf0]  ;;  %v3396_v29 = vor.u32 %v4552_v22, %v3395_v21  ;;  %v3475_v2 = vld [vmem:[#allocation5 + $0x368] sm:$0xf] }
  0x73   :  { %1481 = vmatpush.bf16.msra.mxu3 %v3600_v25  ;;  %v4584_v25 = vld [vmem:[#allocation5 + $0x3d4] sm:$0xf0]  ;;  %v3140_v26 = vor.u32 %v4488_v19, %v3139_v18  ;;  %v3476_v11 = vor.u32 %v4572_v3, %v3475_v2  ;;  %v3331_v12 = vld [vmem:[#allocation5 + $0x248] sm:$0xf]  ;;  %v3160_v3 = vor.u32 %v4490_v51, %v3157_v52 }
  0x74   :  { %1456 = vmatpush.bf16.msra.mxu0 %v3328_v33  ;;  %v3524_v32 = vor.u32 %v4584_v25, %v3523_v24  ;;  %v3379_v33 = vld [vmem:[#allocation5 + $0x2a8] sm:$0xf]  ;;  %v4504_v19 = vld [vmem:[#allocation5 + $0x154] sm:$0xf0] }
  0x75   :  { %1469 = vmatpush.bf16.msra.mxu1 %v3456_v35  ;;  %v4548_v35 = vld [vmem:[#allocation5 + $0x2b4] sm:$0xf0]  ;;  %v3459_v15 = vld [vmem:[#allocation5 + $0x348] sm:$0xf] }
  0x76   :  { %1494 = vmatpush.bf16.msrb.mxu2 %v3728_v31  ;;  %v4484_v31 = vld [vmem:[#allocation5 + $0xb4] sm:$0xf0]  ;;  %v3380_v43 = vor.u32 %v4548_v35, %v3379_v33  ;;  %v3203_v18 = vld [vmem:[#allocation5 + $0x148] sm:$0xf] }
  0x77   :  { %1482 = vmatpush.bf16.msra.mxu3 %v3584_v40  ;;  %v3124_v40 = vor.u32 %v4484_v31, %v3123_v30  ;;  %v3059_v21 = vld [vmem:[#allocation5 + $0x28] sm:$0xf]  ;;  %v4468_v22 = vld [vmem:[#allocation5 + $0x34] sm:$0xf0] }
  0x78   :  { %1457 = vmatpush.bf16.msra.mxu0 %v3312_v49  ;;  %v4544_v49 = vld [vmem:[#allocation5 + $0x294] sm:$0xf0]  ;;  %v3315_v24 = vld [vmem:[#allocation5 + $0x228] sm:$0xf] }
  0x79   :  { %1470 = vmatpush.bf16.msra.mxu1 %v3440_v50  ;;  %v3252_v50 = vor.u32 %v4516_v42, %v3251_v41  ;;  %v3364_v58 = vor.u32 %v4544_v49, %v3363_v47  ;;  %v4532_v25 = vld [vmem:[#allocation5 + $0x234] sm:$0xf0]  ;;  %v3443_v27 = vld [vmem:[#allocation5 + $0x328] sm:$0xf] }
  0x7a   :  { %1495 = vmatpush.bf16.msrb.mxu2 %v3712_v45  ;;  %v4480_v45 = vld [vmem:[#allocation5 + $0x94] sm:$0xf0]  ;;  %v3187_v30 = vld [vmem:[#allocation5 + $0x128] sm:$0xf]  ;;  %v3316_v33 = vor.u32 %v4532_v25, %v3315_v24 }
  0x7b   :  { %1483 = vmatpush.bf16.msra.mxu3 %v3568_v55  ;;  %v3108_v54 = vor.u32 %v4480_v45, %v3107_v44  ;;  %v3235_v55 = vld [vmem:[#allocation5 + $0x188] sm:$0xf]  ;;  %v4564_v28 = vld [vmem:[#allocation5 + $0x334] sm:$0xf0] }
  0x7c   :  { %1458 = vmatpush.bf16.msra.mxu0 %v3296_v4  ;;  %v3236_v1 = vor.u32 %v4512_v56, %v3235_v55  ;;  %v3092_v4 = vor.u32 %v4476_v61, %v3091_v59  ;;  %v4500_v31 = vld [vmem:[#allocation5 + $0x134] sm:$0xf0]  ;;  %v3444_v38 = vor.u32 %v4564_v28, %v3443_v27  ;;  %v3299_v41 = vld [vmem:[#allocation5 + $0x208] sm:$0xf]  ;;  %v3253_v27 = vld [vmem:[#allocation5 + $0x1b8] sm:$0xf0] }
  0x7d   :  { %1471 = vmatpush.bf16.msra.mxu1 %v3424_v5  ;;  %v3219_v5 = vld [vmem:[#allocation5 + $0x168] sm:$0xf]  ;;  %v4464_v35 = vld [vmem:[#allocation5 + $0x14] sm:$0xf0]  ;;  %v3188_v44 = vor.u32 %v4500_v31, %v3187_v30  ;;  %v4478_v30 = vld [vmem:[#allocation5 + $0x8c] sm:$0xf] }
  0x7e   :  { %1496 = vmatpush.bf16.msrb.mxu2 %v3696_v0  ;;  %v4540_v0 = vld [vmem:[#allocation5 + $0x274] sm:$0xf0]  ;;  %v3220_v14 = vor.u32 %v4508_v6, %v3219_v5  ;;  %v3795_v56 = vld [vmem:[#allocation5 + $0x5e8] sm:$0xf]  ;;  %v4486_v5 = vld [vmem:[#allocation5 + $0xcc] sm:$0xf] }
  0x7f   :  { %1484 = vmatpush.bf16.msra.mxu3 %v3552_v8  ;;  %1459 = vmatmul.bf16.vlgmr.msra.gmra.mxu0 %v5076_v53  ;;  %v3348_v7 = vor.u32 %v4540_v0, %v3347_v63  ;;  %v3075_v8 = vld [vmem:[#allocation5 + $0x48] sm:$0xf]  ;;  %v4620_v37 = vld [vmem:[#allocation5 + $0x4f4] sm:$0xf0]  ;;  %v4522_v0 = vld [vmem:[#allocation5 + $0x1ec] sm:$0xf] }
  0x80   :  { %1542 = vmatpush.bf16.msrb.mxu0 %v3412_v16  ;;  %1472 = vmatmul.bf16.vlgmr.msra.gmra.mxu1 %v5080_v60  ;;  %v4568_v16 = vld [vmem:[#allocation5 + $0x354] sm:$0xf0]  ;;  %v3651_v59 = vld [vmem:[#allocation5 + $0x4c8] sm:$0xf]  ;;  %v3141_v6 = vld [vmem:[#allocation5 + $0xd8] sm:$0xf0] }
  0x81   :  { %1516 = vmatpush.bf16.msrb.mxu1 %v3156_v10  ;;  %v4472_v10 = vld [vmem:[#allocation5 + $0x54] sm:$0xf0]  ;;  %v3619_v24 = vld [vmem:[#allocation5 + $0x488] sm:$0xf]  ;;  %v3109_v31 = vld [vmem:[#allocation5 + $0x98] sm:$0xf0] }
  0x82   :  { %1497 = vmatpush.bf16.msrb.mxu2 %v3680_v17  ;;  %1485 = vmatmul.bf16.vlgmr.msra.gmra.mxu3 %v5092_v34  ;;  %v3076_v17 = vor.u32 %v4472_v10, %v3075_v8  ;;  %v4528_v42 = vld [vmem:[#allocation5 + $0x214] sm:$0xf0]  ;;  %v3779_v10 = vld [vmem:[#allocation5 + $0x5c8] sm:$0xf] }
  0x83   :  { %1510 = vmatpush.bf16.msrb.mxu3 %v3808_v13  ;;  %v4536_v13 = vld [vmem:[#allocation5 + $0x254] sm:$0xf0]  ;;  %v3300_v55 = vor.u32 %v4528_v42, %v3299_v41  ;;  %v3237_v41 = vld [vmem:[#allocation5 + $0x198] sm:$0xf0]  ;;  %v3112_v42 = vor.u32 %v4478_v30, %v3109_v31  ;;  %v3587_v51 = vld [vmem:[#allocation5 + $0x448] sm:$0xf] }
  0x84   :  { %1543 = vmatpush.bf16.msrb.mxu0 %v3396_v29  ;;  %v3060_v29 = vor.u32 %v4468_v22, %v3059_v21  ;;  %v4560_v45 = vld [vmem:[#allocation5 + $0x314] sm:$0xf0]  ;;  %v3763_v22 = vld [vmem:[#allocation5 + $0x5a8] sm:$0xf]  ;;  %v3541_v30 = vld [vmem:[#allocation5 + $0x3f8] sm:$0xf0] }
  0x85   :  { %1517 = vmatpush.bf16.msrb.mxu1 %v3140_v26  ;;  %1498 = vmatmul.bf16.vlgmr.msrb.gmra.mxu2 %v5094_v39  ;;  %v3204_v26 = vor.u32 %v4504_v19, %v3203_v18  ;;  %v4656_v47 = vld [vmem:[#allocation5 + $0x614] sm:$0xf0]  ;;  %v4482_v18 = vld [vmem:[#allocation5 + $0xac] sm:$0xf]  ;;  %v3125_v19 = vld [vmem:[#allocation5 + $0xb8] sm:$0xf0] }
  0x86   :  { %1555 = vmatpush.bf16.msra.mxu2 %v3540_v20  ;;  %v3332_v20 = vor.u32 %v4536_v13, %v3331_v12  ;;  %v3635_v12 = vld [vmem:[#allocation5 + $0x4a8] sm:$0xf]  ;;  %v4612_v13 = vld [vmem:[#allocation5 + $0x4b4] sm:$0xf0]  ;;  %v3128_v28 = vor.u32 %v4482_v18, %v3125_v19  ;;  %v3189_v18 = vld [vmem:[#allocation5 + $0x138] sm:$0xf0] }
  0x87   :  { %1529 = vmatpush.bf16.msra.mxu3 %v3284_v23  ;;  %v3460_v23 = vor.u32 %v4568_v16, %v3459_v15  ;;  %v3269_v15 = vld [vmem:[#allocation5 + $0x1d8] sm:$0xf0]  ;;  %v3144_v16 = vor.u32 %v4486_v5, %v3141_v6  ;;  %v4608_v25 = vld [vmem:[#allocation5 + $0x494] sm:$0xf0] }
  0x88   :  { %1544 = vmatpush.bf16.msrb.mxu0 %v3380_v43  ;;  %v3427_v43 = vld [vmem:[#allocation5 + $0x308] sm:$0xf]  ;;  %v4600_v52 = vld [vmem:[#allocation5 + $0x454] sm:$0xf0]  ;;  %v3205_v5 = vld [vmem:[#allocation5 + $0x158] sm:$0xf0] }
  0x89   :  { %1518 = vmatpush.bf16.msrb.mxu1 %v3124_v40  ;;  %v3171_v40 = vld [vmem:[#allocation5 + $0x108] sm:$0xf]  ;;  %v3428_v61 = vor.u32 %v4560_v45, %v3427_v43  ;;  %v3093_v45 = vld [vmem:[#allocation5 + $0x78] sm:$0xf0] }
  0x8a   :  { %1556 = vmatpush.bf16.msra.mxu2 %v3524_v32  ;;  %v3043_v32 = vld [vmem:[#allocation5 + $0x8] sm:$0xf] }
  0x8b   :  { %1530 = vmatpush.bf16.msra.mxu3 %v3268_v36  ;;  %v3667_v36 = vld [vmem:[#allocation5 + $0x4e8] sm:$0xf]  ;;  %v3044_v49 = vor.u32 %v4464_v35, %v3043_v32  ;;  %v3620_v32 = vor.u32 %v4608_v25, %v3619_v24  ;;  %v4462_v24 = vld [vmem:[#allocation5 + $0xc] sm:$0xf]  ;;  %v3045_v25 = vld [vmem:[#allocation5 + $0x18] sm:$0xf0] }
  0x8c   :  { %1545 = vmatpush.bf16.msrb.mxu0 %v3364_v58  ;;  %v4652_v58 = vld [vmem:[#allocation5 + $0x5f4] sm:$0xf0]  ;;  %v3747_v35 = vld [vmem:[#allocation5 + $0x588] sm:$0xf] }
  0x8d   :  { %1519 = vmatpush.bf16.msrb.mxu1 %v3108_v54  ;;  %v3668_v54 = vor.u32 %v4620_v37, %v3667_v36  ;;  %v4640_v36 = vld [vmem:[#allocation5 + $0x594] sm:$0xf0]  ;;  %v3603_v37 = vld [vmem:[#allocation5 + $0x468] sm:$0xf] }
  0x8e   :  { %1557 = vmatpush.bf16.msra.mxu2 %v3508_v46  ;;  %v3811_v46 = vld [vmem:[#allocation5 + $0x608] sm:$0xf]  ;;  %v3748_v43 = vor.u32 %v4640_v36, %v3747_v35  ;;  %v4550_v35 = vld [vmem:[#allocation5 + $0x2cc] sm:$0xf]  ;;  %v3048_v36 = vor.u32 %v4462_v24, %v3045_v25 }
  0x8f   :  { %1531 = vmatpush.bf16.msra.mxu3 %v3252_v50  ;;  %v4496_v50 = vld [vmem:[#allocation5 + $0x114] sm:$0xf0]  ;;  %v3812_v63 = vor.u32 %v4656_v47, %v3811_v46  ;;  %v4570_v24 = vld [vmem:[#allocation5 + $0x36c] sm:$0xf] }
  0x90   :  { %1546 = vmatpush.bf16.msrb.mxu0 %v3348_v7  ;;  %v3172_v2 = vor.u32 %v4496_v50, %v3171_v40  ;;  %v4510_v40 = vld [vmem:[#allocation5 + $0x18c] sm:$0xf]  ;;  %v4636_v50 = vld [vmem:[#allocation5 + $0x574] sm:$0xf0] }
  0x91   :  { %1520 = vmatpush.bf16.msrb.mxu1 %v3092_v4  ;;  %v3796_v4 = vor.u32 %v4652_v58, %v3795_v56  ;;  %v3240_v47 = vor.u32 %v4510_v40, %v3237_v41  ;;  %v3173_v40 = vld [vmem:[#allocation5 + $0x118] sm:$0xf0] }
  0x92   :  { %1558 = vmatpush.bf16.msra.mxu2 %v3492_v62  ;;  %3818 = vmatmul.msk.bf16.vlgmr.msrb.gmra.mxu3 %vm1330_vm0, %v5088_v48  ;;  %v4616_v62 = vld [vmem:[#allocation5 + $0x4d4] sm:$0xf0] }
  0x93   :  { %1532 = vmatpush.bf16.msra.mxu3 %v3236_v1  ;;  %v3285_v1 = vld [vmem:[#allocation5 + $0x1f8] sm:$0xf0]  ;;  %v3652_v7 = vor.u32 %v4616_v62, %v3651_v59  ;;  %v4470_v59 = vld [vmem:[#allocation5 + $0x4c] sm:$0xf]  ;;  %v3588_v62 = vor.u32 %v4600_v52, %v3587_v51 }
  0x94   :  { %1547 = vmatpush.bf16.msrb.mxu0 %v3332_v20  ;;  %v3288_v8 = vor.u32 %v4522_v0, %v3285_v1  ;;  %v3636_v20 = vor.u32 %v4612_v13, %v3635_v12  ;;  %v3715_v0 = vld [vmem:[#allocation5 + $0x548] sm:$0xf]  ;;  %v4632_v1 = vld [vmem:[#allocation5 + $0x554] sm:$0xf0]  ;;  %v4614_v51 = vld [vmem:[#allocation5 + $0x4cc] sm:$0xf] }
  0x95   :  { %1521 = vmatpush.bf16.msrb.mxu1 %v3076_v17  ;;  %v3699_v13 = vld [vmem:[#allocation5 + $0x528] sm:$0xf]  ;;  %v3653_v52 = vld [vmem:[#allocation5 + $0x4d8] sm:$0xf0] }
  0x96   :  { %1559 = vmatpush.bf16.msra.mxu2 %v3476_v11  ;;  %v4648_v11 = vld [vmem:[#allocation5 + $0x5d4] sm:$0xf0] }
  0x97   :  { %1533 = vmatpush.bf16.msra.mxu3 %v3220_v14  ;;  %v4518_v14 = vld [vmem:[#allocation5 + $0x1cc] sm:$0xf]  ;;  %v3780_v17 = vor.u32 %v4648_v11, %v3779_v10  ;;  %v3061_v10 = vld [vmem:[#allocation5 + $0x38] sm:$0xf0] }
  0x98   :  { %1548 = vmatpush.bf16.msrb.mxu0 %v3316_v33  ;;  %v3272_v21 = vor.u32 %v4518_v14, %v3269_v15  ;;  %v4628_v14 = vld [vmem:[#allocation5 + $0x534] sm:$0xf0]  ;;  %v3555_v15 = vld [vmem:[#allocation5 + $0x408] sm:$0xf] }
  0x99   :  { %1522 = vmatpush.bf16.msrb.mxu1 %v3060_v29 }
  0x9a   :  { %1560 = vmatpush.bf16.msra.mxu2 %v3460_v23  ;;  %v4644_v23 = vld [vmem:[#allocation5 + $0x5b4] sm:$0xf0] }
  0x9b   :  { %1534 = vmatpush.bf16.msra.mxu3 %v3204_v26  ;;  %v4514_v26 = vld [vmem:[#allocation5 + $0x1ac] sm:$0xf]  ;;  %v3764_v29 = vor.u32 %v4644_v23, %v3763_v22  ;;  %v3700_v22 = vor.u32 %v4628_v14, %v3699_v13  ;;  %v3683_v23 = vld [vmem:[#allocation5 + $0x508] sm:$0xf]  ;;  %v3493_v14 = vld [vmem:[#allocation5 + $0x398] sm:$0xf0] }
  0x9c   :  { %1549 = vmatpush.bf16.msrb.mxu0 %v3300_v55  ;;  %v3256_v33 = vor.u32 %v4514_v26, %v3253_v27  ;;  %v3221_v55 = vld [vmem:[#allocation5 + $0x178] sm:$0xf0] }
  0x9d   :  { %1523 = vmatpush.bf16.msrb.mxu1 %v3044_v49  ;;  %v3731_v49 = vld [vmem:[#allocation5 + $0x568] sm:$0xf] }
  0x9e   :  { %1561 = vmatpush.bf16.msra.mxu2 %v3444_v38  ;;  %v4604_v38 = vld [vmem:[#allocation5 + $0x474] sm:$0xf0]  ;;  %v3732_v58 = vor.u32 %v4636_v50, %v3731_v49  ;;  %v3525_v50 = vld [vmem:[#allocation5 + $0x3d8] sm:$0xf0] }
  0x9f   :  { %1535 = vmatpush.bf16.msra.mxu3 %v3188_v44  ;;  %1550 = vmatmul.bf16.vlgmr.msrb.gmra.mxu0 %v5076_v53  ;;  %v4474_v44 = vld [vmem:[#allocation5 + $0x6c] sm:$0xf]  ;;  %v3604_v46 = vor.u32 %v4604_v38, %v3603_v37  ;;  %v3397_v37 = vld [vmem:[#allocation5 + $0x2d8] sm:$0xf0] }
  0xa0   :  { %1601 = vmatpush.bf16.msra.mxu0 %v3812_v63  ;;  %1524 = vmatmul.bf16.vlgmr.msrb.gmra.mxu1 %v5078_v57  ;;  %v3096_v56 = vor.u32 %v4474_v44, %v3093_v45  ;;  %v4494_v38 = vld [vmem:[#allocation5 + $0x10c] sm:$0xf] }
  0xa1   :  { %1568 = vmatpush.bf16.msra.mxu1 %v3668_v54  ;;  %v4506_v54 = vld [vmem:[#allocation5 + $0x16c] sm:$0xf]  ;;  %v3176_v49 = vor.u32 %v4494_v38, %v3173_v40 }
  0xa2   :  { %1562 = vmatpush.bf16.msra.mxu2 %v3428_v61  ;;  %v3077_v61 = vld [vmem:[#allocation5 + $0x58] sm:$0xf0]  ;;  %v3224_v63 = vor.u32 %v4506_v54, %v3221_v55  ;;  %v4546_v55 = vld [vmem:[#allocation5 + $0x2ac] sm:$0xf] }
  0xa3   :  { %1536 = vmatpush.bf16.msra.mxu3 %v3172_v2  ;;  %v3571_v2 = vld [vmem:[#allocation5 + $0x428] sm:$0xf]  ;;  %v3080_v6 = vor.u32 %v4470_v59, %v3077_v61  ;;  %v3781_v59 = vld [vmem:[#allocation5 + $0x5d8] sm:$0xf0]  ;;  %v4566_v38 = vld [vmem:[#allocation5 + $0x34c] sm:$0xf] }
  0xa4   :  { %1620 = vmatpush.bf16.msrb.mxu0 %v3288_v8  ;;  %v4466_v8 = vld [vmem:[#allocation5 + $0x2c] sm:$0xf] }
  0xa5   :  { %1569 = vmatpush.bf16.msra.mxu1 %v3652_v7  ;;  %1563 = vmatmul.bf16.vlgmr.msra.gmra.mxu2 %v5080_v60  ;;  %v3716_v7 = vor.u32 %v4632_v1, %v3715_v0  ;;  %v3064_v19 = vor.u32 %v4466_v8, %v3061_v10  ;;  %v3509_v1 = vld [vmem:[#allocation5 + $0x3b8] sm:$0xf0] }
  0xa6   :  { %1607 = vmatpush.bf16.msrb.mxu2 %v3160_v3  ;;  %1537 = vmatmul.bf16.vlgmr.msra.gmra.mxu3 %v5084_v9  ;;  %v4596_v3 = vld [vmem:[#allocation5 + $0x434] sm:$0xf0]  ;;  %v3765_v8 = vld [vmem:[#allocation5 + $0x5b8] sm:$0xf0] }
  0xa7   :  { %1581 = vmatpush.bf16.msrb.mxu3 %v3796_v4  ;;  %v4502_v4 = vld [vmem:[#allocation5 + $0x14c] sm:$0xf]  ;;  %v3572_v11 = vor.u32 %v4596_v3, %v3571_v2  ;;  %v3637_v3 = vld [vmem:[#allocation5 + $0x4b8] sm:$0xf0] }
  0xa8   :  { %1621 = vmatpush.bf16.msrb.mxu0 %v3272_v21  ;;  %v3208_v12 = vor.u32 %v4502_v4, %v3205_v5  ;;  %v3413_v21 = vld [vmem:[#allocation5 + $0x2f8] sm:$0xf0]  ;;  %v4610_v2 = vld [vmem:[#allocation5 + $0x4ac] sm:$0xf] }
  0xa9   :  { %1570 = vmatpush.bf16.msra.mxu1 %v3636_v20  ;;  %v4554_v20 = vld [vmem:[#allocation5 + $0x2ec] sm:$0xf] }
  0xaa   :  { %1608 = vmatpush.bf16.msrb.mxu2 %v3144_v16  ;;  %v4592_v16 = vld [vmem:[#allocation5 + $0x414] sm:$0xf0]  ;;  %v3416_v31 = vor.u32 %v4554_v20, %v3413_v21  ;;  %v4542_v5 = vld [vmem:[#allocation5 + $0x28c] sm:$0xf]  ;;  %v3749_v21 = vld [vmem:[#allocation5 + $0x598] sm:$0xf0] }
  0xab   :  { %1582 = vmatpush.bf16.msrb.mxu3 %v3780_v17  ;;  %v4498_v17 = vld [vmem:[#allocation5 + $0x12c] sm:$0xf]  ;;  %v3556_v26 = vor.u32 %v4592_v16, %v3555_v15  ;;  %v3621_v16 = vld [vmem:[#allocation5 + $0x498] sm:$0xf0] }
  0xac   :  { %1622 = vmatpush.bf16.msrb.mxu0 %v3256_v33  ;;  %v3192_v27 = vor.u32 %v4498_v17, %v3189_v18  ;;  %v3669_v33 = vld [vmem:[#allocation5 + $0x4f8] sm:$0xf0]  ;;  %v4606_v15 = vld [vmem:[#allocation5 + $0x48c] sm:$0xf] }
  0xad   :  { %1571 = vmatpush.bf16.msra.mxu1 %v3620_v32  ;;  %v4618_v32 = vld [vmem:[#allocation5 + $0x4ec] sm:$0xf] }
  0xae   :  { %1609 = vmatpush.bf16.msrb.mxu2 %v3128_v28  ;;  %v4624_v28 = vld [vmem:[#allocation5 + $0x514] sm:$0xf0]  ;;  %v3672_v45 = vor.u32 %v4618_v32, %v3669_v33  ;;  %v4538_v18 = vld [vmem:[#allocation5 + $0x26c] sm:$0xf]  ;;  %v3733_v33 = vld [vmem:[#allocation5 + $0x578] sm:$0xf0] }
  0xaf   :  { %1583 = vmatpush.bf16.msrb.mxu3 %v3764_v29  ;;  %3819 = vmatmul.msk.bf16.vlgmr.msra.gmra.mxu0 %vm1330_vm0, %v5088_v48  ;;  %v4586_v29 = vld [vmem:[#allocation5 + $0x3ec] sm:$0xf]  ;;  %v3684_v41 = vor.u32 %v4624_v28, %v3683_v23  ;;  %v3624_v23 = vor.u32 %v4606_v15, %v3621_v16  ;;  %v3605_v28 = vld [vmem:[#allocation5 + $0x478] sm:$0xf0] }
  0xb0   :  { %1623 = vmatpush.bf16.msrb.mxu0 %v3240_v47  ;;  %v3544_v44 = vor.u32 %v4586_v29, %v3541_v30  ;;  %v3400_v47 = vor.u32 %v4550_v35, %v3397_v37  ;;  %v4534_v30 = vld [vmem:[#allocation5 + $0x24c] sm:$0xf]  ;;  %v3557_v15 = vld [vmem:[#allocation5 + $0x418] sm:$0xf0] }
  0xb1   :  { %1572 = vmatpush.bf16.msra.mxu1 %v3604_v46  ;;  %v4582_v46 = vld [vmem:[#allocation5 + $0x3cc] sm:$0xf] }
  0xb2   :  { %1610 = vmatpush.bf16.msrb.mxu2 %v3112_v42  ;;  %v4650_v42 = vld [vmem:[#allocation5 + $0x5ec] sm:$0xf]  ;;  %v3528_v61 = vor.u32 %v4582_v46, %v3525_v50 }
  0xb3   :  { %1584 = vmatpush.bf16.msrb.mxu3 %v3748_v43  ;;  %v3797_v43 = vld [vmem:[#allocation5 + $0x5f8] sm:$0xf0]  ;;  %v4634_v32 = vld [vmem:[#allocation5 + $0x56c] sm:$0xf] }
  0xb4   :  { %1624 = vmatpush.bf16.msrb.mxu0 %v3224_v63  ;;  %v3800_v54 = vor.u32 %v4650_v42, %v3797_v43  ;;  %v4578_v63 = vld [vmem:[#allocation5 + $0x3ac] sm:$0xf]  ;;  %v3461_v42 = vld [vmem:[#allocation5 + $0x358] sm:$0xf0] }
  0xb5   :  { %1573 = vmatpush.bf16.msra.mxu1 %v3588_v62  ;;  %v3656_v62 = vor.u32 %v4614_v51, %v3653_v52  ;;  %v3512_v10 = vor.u32 %v4578_v63, %v3509_v1  ;;  %v4598_v43 = vld [vmem:[#allocation5 + $0x44c] sm:$0xf]  ;;  %v3717_v51 = vld [vmem:[#allocation5 + $0x558] sm:$0xf0]  ;;  %v3464_v52 = vor.u32 %v4566_v38, %v3461_v42  ;;  %v3903_v42 = vld [vmem:[#allocation8 + $0xa0] sm:$0xf] }
  0xb6   :  { %1611 = vmatpush.bf16.msrb.mxu2 %v3096_v56  ;;  %v3381_v56 = vld [vmem:[#allocation5 + $0x2b8] sm:$0xf0]  ;;  %v4530_v46 = vld [vmem:[#allocation5 + $0x22c] sm:$0xf] }
  0xb7   :  { %1585 = vmatpush.bf16.msrb.mxu3 %v3732_v58  ;;  %v4646_v58 = vld [vmem:[#allocation5 + $0x5cc] sm:$0xf]  ;;  %v3384_v0 = vor.u32 %v4546_v55, %v3381_v56 }
  0xb8   :  { %1625 = vmatpush.bf16.msrb.mxu0 %v3208_v12  ;;  %v3784_v4 = vor.u32 %v4646_v58, %v3781_v59  ;;  %v4574_v12 = vld [vmem:[#allocation5 + $0x38c] sm:$0xf]  ;;  %v3445_v58 = vld [vmem:[#allocation5 + $0x338] sm:$0xf0] }
  0xb9   :  { %1574 = vmatpush.bf16.msra.mxu1 %v3572_v11  ;;  %v3640_v11 = vor.u32 %v4610_v2, %v3637_v3  ;;  %v4630_v50 = vld [vmem:[#allocation5 + $0x54c] sm:$0xf]  ;;  %v3701_v3 = vld [vmem:[#allocation5 + $0x538] sm:$0xf0] }
  0xba   :  { %1612 = vmatpush.bf16.msrb.mxu2 %v3080_v6  ;;  %v3365_v6 = vld [vmem:[#allocation5 + $0x298] sm:$0xf0]  ;;  %v4562_v55 = vld [vmem:[#allocation5 + $0x32c] sm:$0xf] }
  0xbb   :  { %1586 = vmatpush.bf16.msrb.mxu3 %v3716_v7  ;;  %v4642_v7 = vld [vmem:[#allocation5 + $0x5ac] sm:$0xf]  ;;  %v3368_v13 = vor.u32 %v4542_v5, %v3365_v6  ;;  %v5116_v20 = vpop.f32.mrf.mxu0  ;;  %v3813_v5 = vld [vmem:[#allocation5 + $0x618] sm:$0xf0]  ;;  %v5124_v6 = vld [vmem:[#allocation7] sm:$0xf] }
  0xbc   :  { %1626 = vmatpush.bf16.msrb.mxu0 %v3192_v27  ;;  %v3768_v17 = vor.u32 %v4642_v7, %v3765_v8  ;;  %v4602_v27 = vld [vmem:[#allocation5 + $0x46c] sm:$0xf]  ;;  %v5118_v29 = vpop.f32.mrf.mxu1  ;;  %v3448_v8 = vor.u32 %v4562_v55, %v3445_v58 }
  0xbd   :  { %1575 = vmatpush.bf16.msra.mxu1 %v3556_v26  ;;  %v3477_v26 = vld [vmem:[#allocation5 + $0x378] sm:$0xf0]  ;;  %v3608_v37 = vor.u32 %v4602_v27, %v3605_v28  ;;  %v4594_v59 = vld [vmem:[#allocation5 + $0x42c] sm:$0xf] }
  0xbe   :  { %1613 = vmatpush.bf16.msrb.mxu2 %v3064_v19  ;;  %v3349_v19 = vld [vmem:[#allocation5 + $0x278] sm:$0xf0]  ;;  %v4526_v63 = vld [vmem:[#allocation5 + $0x20c] sm:$0xf] }
  0xbf   :  { %1587 = vmatpush.bf16.msrb.mxu3 %v3700_v22  ;;  %v3496_v22 = vor.u32 %v4574_v12, %v3493_v14  ;;  %v3352_v25 = vor.u32 %v4538_v18, %v3349_v19  ;;  %v4626_v1 = vld [vmem:[#allocation5 + $0x52c] sm:$0xf]  ;;  %v3935_v18 = vld [vmem:[#allocation8 + $0xe0] sm:$0xf]  ;;  %v4687_v19 = vld [vmem:[#allocation8 + $0xec] sm:$0xf0] }
  0xc0   :  { %1576 = vmatmul.bf16.vlgmr.msra.gmra.mxu1 %v5092_v34  ;;  %1627 = vmatpush.bf16.msrb.mxu0 %v3176_v49  ;;  %v4590_v14 = vld [vmem:[#allocation5 + $0x40c] sm:$0xf]  ;;  %v3936_v28 = vor.u32 %v4687_v19, %v3935_v18  ;;  %v3823_v18 = vld [vmem:[#allocation8] sm:$0xf]  ;;  %v4659_v19 = vld [vmem:[#allocation8 + $0xc] sm:$0xf0] }
  0xc1   :  { %1633 = vmatpush.bf16.msrb.mxu1 %v3416_v31  ;;  %v3333_v31 = vld [vmem:[#allocation5 + $0x258] sm:$0xf0]  ;;  %v3560_v27 = vor.u32 %v4590_v14, %v3557_v15  ;;  %v3967_v15 = vld [vmem:[#allocation8 + $0x120] sm:$0xf] }
  0xc2   :  { %1614 = vmatpush.bf16.msrb.mxu2 %v3048_v36  ;;  %v3480_v36 = vor.u32 %v4570_v24, %v3477_v26  ;;  %v3336_v40 = vor.u32 %v4534_v30, %v3333_v31  ;;  %v4719_v24 = vld [vmem:[#allocation8 + $0x1ec] sm:$0xf0]  ;;  %v3919_v30 = vld [vmem:[#allocation8 + $0xc0] sm:$0xf] }
  0xc3   :  { %1588 = vmatpush.bf16.msrb.mxu3 %v3684_v41  ;;  %1628 = vmatmul.bf16.vlgmr.msrb.gmra.mxu0 %v5084_v9  ;;  %v5120_v35 = vpop.f32.mrf.mxu2  ;;  %v1345_v49 = vpop.f32.mrf.mxu0  ;;  %v4683_v31 = vld [vmem:[#allocation8 + $0xcc] sm:$0xf0] }
  0xc4   :  { %1672 = vmatpush.bf16.msra.mxu0 %v3800_v54  ;;  %v1358_v2 = vpop.f32.mrf.mxu1  ;;  %v4675_v49 = vld [vmem:[#allocation8 + $0x8c] sm:$0xf0] }
  0xc5   :  { %1634 = vmatpush.bf16.msrb.mxu1 %v3400_v47  ;;  %1615 = vmatmul.bf16.vlgmr.msrb.gmra.mxu2 %v5078_v57  ;;  %v4638_v57 = vld [vmem:[#allocation5 + $0x58c] sm:$0xf]  ;;  %v5122_v41 = vpop.f32.mrf.mxu3  ;;  %v3317_v47 = vld [vmem:[#allocation5 + $0x238] sm:$0xf0]  ;;  %v4667_v2 = vld [vmem:[#allocation8 + $0x4c] sm:$0xf0] }
  0xc6   :  { %1659 = vmatpush.bf16.msra.mxu2 %v3672_v45  ;;  %1589 = vmatmul.bf16.vlgmr.msrb.gmra.mxu3 %v5094_v39  ;;  %v3752_v9 = vor.u32 %v4638_v57, %v3749_v21  ;;  %v3736_v45 = vor.u32 %v4634_v32, %v3733_v33  ;;  %v3320_v56 = vor.u32 %v4530_v46, %v3317_v47  ;;  %v4622_v57 = vld [vmem:[#allocation5 + $0x50c] sm:$0xf]  ;;  %v4047_v33 = vld [vmem:[#allocation8 + $0x1c0] sm:$0xf]  ;;  %v4711_v46 = vld [vmem:[#allocation8 + $0x1ac] sm:$0xf0] }
  0xc7   :  { %1646 = vmatpush.bf16.msra.mxu3 %v3544_v44  ;;  %v3589_v44 = vld [vmem:[#allocation5 + $0x458] sm:$0xf0] }
  0xc8   :  { %1673 = vmatpush.bf16.msra.mxu0 %v3784_v4  ;;  %v3592_v54 = vor.u32 %v4598_v43, %v3589_v44  ;;  %v4654_v4 = vld [vmem:[#allocation5 + $0x60c] sm:$0xf]  ;;  %v4679_v43 = vld [vmem:[#allocation8 + $0xac] sm:$0xf0] }
  0xc9   :  { %1635 = vmatpush.bf16.msrb.mxu1 %v3384_v0  ;;  %v3301_v0 = vld [vmem:[#allocation5 + $0x218] sm:$0xf0]  ;;  %v3816_v21 = vor.u32 %v4654_v4, %v3813_v5  ;;  %v3983_v4 = vld [vmem:[#allocation8 + $0x140] sm:$0xf]  ;;  %v4699_v5 = vld [vmem:[#allocation8 + $0x14c] sm:$0xf0] }
  0xca   :  { %1660 = vmatpush.bf16.msra.mxu2 %v3656_v62  ;;  %v3720_v62 = vor.u32 %v4630_v50, %v3717_v51  ;;  %v3304_v12 = vor.u32 %v4526_v63, %v3301_v0  ;;  %v3984_v14 = vor.u32 %v4699_v5, %v3983_v4  ;;  %v4735_v4 = vld [vmem:[#allocation8 + $0x26c] sm:$0xf0]  ;;  %v319_v5 = vperm.slane %v5124_v6, 1 }
  0xcb   :  { %1647 = vmatpush.bf16.msra.mxu3 %v3528_v61  ;;  %v3573_v61 = vld [vmem:[#allocation5 + $0x438] sm:$0xf0]  ;;  %v1371_v7 = vpop.f32.mrf.mxu2 }
  0xcc   :  { %1674 = vmatpush.bf16.msra.mxu0 %v3768_v17  ;;  %v3704_v17 = vor.u32 %v4626_v1, %v3701_v3  ;;  %v3855_v1 = vld [vmem:[#allocation8 + $0x40] sm:$0xf] }
  0xcd   :  { %1636 = vmatpush.bf16.msrb.mxu1 %v3368_v13  ;;  %v3429_v13 = vld [vmem:[#allocation5 + $0x318] sm:$0xf0]  ;;  %v1384_v16 = vpop.f32.mrf.mxu3 }
  0xce   :  { %1661 = vmatpush.bf16.msra.mxu2 %v3640_v11  ;;  %v4558_v11 = vld [vmem:[#allocation5 + $0x30c] sm:$0xf]  ;;  %v4695_v16 = vld [vmem:[#allocation8 + $0x12c] sm:$0xf0] }
  0xcf   :  { %1648 = vmatpush.bf16.msra.mxu3 %v3512_v10  ;;  %v3576_v10 = vor.u32 %v4594_v59, %v3573_v61  ;;  %v3432_v26 = vor.u32 %v4558_v11, %v3429_v13  ;;  %v4671_v59 = vld [vmem:[#allocation8 + $0x6c] sm:$0xf0]  ;;  %v3999_v61 = vld [vmem:[#allocation8 + $0x160] sm:$0xf] }
  0xd0   :  { %1675 = vmatpush.bf16.msra.mxu0 %v3752_v9  ;;  %v4663_v13 = vld [vmem:[#allocation8 + $0x2c] sm:$0xf0] }
  0xd1   :  { %1637 = vmatpush.bf16.msrb.mxu1 %v3352_v25  ;;  %v318_v25 = vperm.slane %v5124_v6, 0 }
  0xd2   :  { %1662 = vmatpush.bf16.msra.mxu2 %v3624_v23  ;;  %v4063_v23 = vld [vmem:[#allocation8 + $0x1e0] sm:$0xf] }
  0xd3   :  { %1649 = vmatpush.bf16.msra.mxu3 %v3496_v22  ;;  %v3685_v22 = vld [vmem:[#allocation5 + $0x518] sm:$0xf0]  ;;  %v4064_v32 = vor.u32 %v4719_v24, %v4063_v23  ;;  %v5129_v38 = vpop.f32.mrf.mxu2  ;;  %v4751_v23 = vld [vmem:[#allocation8 + $0x2ec] sm:$0xf0] }
  0xd4   :  { %1676 = vmatpush.bf16.msra.mxu0 %v3736_v45  ;;  %v3688_v9 = vor.u32 %v4622_v57, %v3685_v22  ;;  %v4031_v45 = vld [vmem:[#allocation8 + $0x1a0] sm:$0xf] }
  0xd5   :  { %1638 = vmatpush.bf16.msrb.mxu1 %v3336_v40  ;;  %v3920_v40 = vor.u32 %v4683_v31, %v3919_v30  ;;  %v4032_v50 = vor.u32 %v4711_v46, %v4031_v45  ;;  %v4191_v22 = vld [vmem:[#allocation8 + $0x2e0] sm:$0xf]  ;;  %v4065_v30 = vld [vmem:[#allocation8 + $0x1f0] sm:$0xf0]  ;;  %v3824_v31 = vor.u32 %v4659_v19, %v3823_v18  ;;  %v4713_v46 = vld [vmem:[#allocation8 + $0x1c4] sm:$0xf] }
  0xd6   :  { %1663 = vmatpush.bf16.msra.mxu2 %v3608_v37  ;;  %v1344_v37 = vadd.f32 %v5116_v20, %v318_v25  ;;  %v3887_v20 = vld [vmem:[#allocation8 + $0x80] sm:$0xf]  ;;  %v3937_v25 = vld [vmem:[#allocation8 + $0xf0] sm:$0xf0]  ;;  %v4665_v19 = vld [vmem:[#allocation8 + $0x44] sm:$0xf] }
  0xd7   :  { %1650 = vmatpush.bf16.msra.mxu3 %v3480_v36  ;;  %v4715_v36 = vld [vmem:[#allocation8 + $0x1cc] sm:$0xf0]  ;;  %v3888_v58 = vor.u32 %v4675_v49, %v3887_v20  ;;  %v4159_v49 = vld [vmem:[#allocation8 + $0x2a0] sm:$0xf] }
  0xd8   :  { %1677 = vmatpush.bf16.msra.mxu0 %v3720_v62  ;;  %v4048_v44 = vor.u32 %v4715_v36, %v4047_v33  ;;  %v1357_v47 = vadd.f32 %v5118_v29, %v1344_v37  ;;  %v3871_v29 = vld [vmem:[#allocation8 + $0x60] sm:$0xf] }
  0xd9   :  { %1639 = vmatpush.bf16.msrb.mxu1 %v3320_v56  ;;  %v3872_v63 = vor.u32 %v4671_v59, %v3871_v29  ;;  %v4143_v29 = vld [vmem:[#allocation8 + $0x280] sm:$0xf]  ;;  %v4739_v59 = vld [vmem:[#allocation8 + $0x28c] sm:$0xf0] }
  0xda   :  { %1664 = vmatpush.bf16.msra.mxu2 %v3592_v54  ;;  %v4707_v54 = vld [vmem:[#allocation8 + $0x18c] sm:$0xf0]  ;;  %v1370_v55 = vadd.f32 %v5120_v35, %v1357_v47  ;;  %v4049_v47 = vld [vmem:[#allocation8 + $0x1d0] sm:$0xf0] }
  0xdb   :  { %1651 = vmatpush.bf16.msra.mxu3 %v3464_v52  ;;  %v4015_v52 = vld [vmem:[#allocation8 + $0x180] sm:$0xf]  ;;  %v1423_v56 = vpop.f32.mrf.mxu2 }
  0xdc   :  { %1678 = vmatpush.bf16.msra.mxu0 %v3704_v17  ;;  %v1395_v51 = vpop.f32.mrf.mxu0  ;;  %v1383_v62 = vadd.f32 %v5122_v41, %v1370_v55  ;;  %v4033_v56 = vld [vmem:[#allocation8 + $0x1b0] sm:$0xf0] }
  0xdd   :  { %1640 = vmatpush.bf16.msrb.mxu1 %v3304_v12  ;;  %v3839_v12 = vld [vmem:[#allocation8 + $0x20] sm:$0xf] }
  0xde   :  { %1665 = vmatpush.bf16.msra.mxu2 %v3576_v10  ;;  %v1396_v0 = vadd.f32 %v1395_v51, %v1383_v62  ;;  %v3856_v10 = vor.u32 %v4667_v2, %v3855_v1  ;;  %v3840_v17 = vor.u32 %v4663_v13, %v3839_v12  ;;  %v4677_v51 = vld [vmem:[#allocation8 + $0xa4] sm:$0xf]  ;;  %v4144_v62 = vor.u32 %v4739_v59, %v4143_v29 }
  0xdf   :  { %1652 = vmatpush.bf16.msra.mxu3 %v3448_v8  ;;  %v4701_v13 = vld [vmem:[#allocation8 + $0x164] sm:$0xf] }
  0xe0   :  { %1641 = vmatmul.bf16.vlgmr.msrb.gmra.mxu1 %v5076_v53  ;;  %1679 = vmatpush.bf16.msra.mxu0 %v3688_v9  ;;  %v3904_v53 = vor.u32 %v4679_v43, %v3903_v42  ;;  %v4717_v9 = vld [vmem:[#allocation8 + $0x1e4] sm:$0xf]  ;;  %v3921_v43 = vld [vmem:[#allocation8 + $0xd0] sm:$0xf0] }
  0xe1   :  { %1692 = vmatpush.bf16.msra.mxu1 %v3816_v21  ;;  %v3968_v21 = vor.u32 %v4695_v16, %v3967_v15  ;;  %v4681_v42 = vld [vmem:[#allocation8 + $0xc4] sm:$0xf]  ;;  %v4111_v16 = vld [vmem:[#allocation8 + $0x240] sm:$0xf] }
  0xe2   :  { %1666 = vmatpush.bf16.msra.mxu2 %v3560_v27  ;;  %v4691_v27 = vld [vmem:[#allocation8 + $0x10c] sm:$0xf0]  ;;  %v3924_v20 = vor.u32 %v4681_v42, %v3921_v43  ;;  %v4657_v42 = vld [vmem:[#allocation8 + $0x4] sm:$0xf] }
  0xe3   :  { %1653 = vmatpush.bf16.msra.mxu3 %v3432_v26  ;;  %1680 = vmatmul.bf16.vlgmr.msra.gmra.mxu0 %v5094_v39  ;;  %v4703_v39 = vld [vmem:[#allocation8 + $0x16c] sm:$0xf0]  ;;  %v3951_v26 = vld [vmem:[#allocation8 + $0x100] sm:$0xf] }
  0xe4   :  { %v4000_v3 = vor.u32 %v4703_v39, %v3999_v61  ;;  %v1397_v7 = vpop.f32.mrf.mxu0  ;;  %v3952_v37 = vor.u32 %v4691_v27, %v3951_v26  ;;  %v3889_v61 = vld [vmem:[#allocation8 + $0x90] sm:$0xf0] }
  0xe5   :  { %2497 = vmatpush.bf16.msrb.mxu1 %v4064_v32  ;;  %1667 = vmatmul.bf16.vlgmr.msra.gmra.mxu2 %v5092_v34  ;;  %v4016_v34 = vor.u32 %v4707_v54, %v4015_v52  ;;  %v5137_v35 = vpop.f32.mrf.mxu3  ;;  %v3905_v52 = vld [vmem:[#allocation8 + $0xb0] sm:$0xf0]  ;;  %v4052_v54 = vor.u32 %v4713_v46, %v4049_v47  ;;  %v4723_v46 = vld [vmem:[#allocation8 + $0x20c] sm:$0xf0]  ;;  %v3943_v47 = vld [vmem:[#allocation8 + $0xe8] sm:$0xf] }
  0xe6   :  { %1654 = vmatmul.bf16.vlgmr.msra.gmra.mxu3 %v5080_v60  ;;  %v1408_v60 = vpop.f32.mrf.mxu1  ;;  %v1435_v18 = vadd.f32 %v5137_v35, %v319_v5 }
  0xe7   :  { %2484 = vmatpush.bf16.msrb.mxu3 %v3936_v28  ;;  %v1409_v41 = vadd.f32 %v1408_v60, %v1396_v0  ;;  %v4192_v28 = vor.u32 %v4751_v23, %v4191_v22  ;;  %v4709_v60 = vld [vmem:[#allocation8 + $0x1a4] sm:$0xf]  ;;  %v4017_v0 = vld [vmem:[#allocation8 + $0x190] sm:$0xf0] }
  0xe8   :  { %v5141_v11 = vpop.f32.mrf.mxu2  ;;  %v4036_v39 = vor.u32 %v4709_v60, %v4033_v56  ;;  %v4697_v23 = vld [vmem:[#allocation8 + $0x144] sm:$0xf] }
  0xe9   :  { %2498 = vmatpush.bf16.msrb.mxu1 %v4048_v44  ;;  %v1422_v57 = vadd.f32 %v5129_v38, %v1409_v41  ;;  %2510 = vmatpush.bf16.msrb.mxu2 %v4192_v28  ;;  %v4175_v38 = vld [vmem:[#allocation8 + $0x2c0] sm:$0xf]  ;;  %v4068_v44 = vor.u32 %v4717_v9, %v4065_v30  ;;  %v4727_v9 = vld [vmem:[#allocation8 + $0x22c] sm:$0xf0]  ;;  %v1448_v30 = vadd.f32 %v5141_v11, %v1435_v18  ;;  %v4071_v18 = vld [vmem:[#allocation8 + $0x1e8] sm:$0xf] }
  0xea   :  { %v4095_v28 = vld [vmem:[#allocation8 + $0x220] sm:$0xf] }
  0xeb   :  { %2485 = vmatpush.bf16.msrb.mxu3 %v3920_v40  ;;  %v1698_v33 = vmax.f32 %v1422_v57, 0.0  ;;  %v4747_v40 = vld [vmem:[#allocation8 + $0x2cc] sm:$0xf0]  ;;  %v3857_v57 = vld [vmem:[#allocation8 + $0x50] sm:$0xf0] }
  0xec   :  { %v4176_v45 = vor.u32 %v4747_v40, %v4175_v38  ;;  %v3860_v27 = vor.u32 %v4665_v19, %v3857_v57  ;;  %v3969_v38 = vld [vmem:[#allocation8 + $0x130] sm:$0xf0]  ;;  %v4720_v19 = vld [vmem:[#allocation8 + $0x1f4] sm:$0xf0] }
  0xed   :  { %2499 = vmatpush.bf16.msrb.mxu1 %v4032_v50  ;;  %v1436_v24 = vpop.f32.mrf.mxu3  ;;  %v4743_v50 = vld [vmem:[#allocation8 + $0x2ac] sm:$0xf0] }
  0xee   :  { %v1410_v8 = vpop.f32.mrf.mxu1  ;;  %2511 = vmatpush.bf16.msrb.mxu2 %v4176_v45  ;;  %v4160_v55 = vor.u32 %v4743_v50, %v4159_v49  ;;  %v3985_v24 = vld [vmem:[#allocation8 + $0x150] sm:$0xf0]  ;;  %v4079_v45 = vld [vmem:[#allocation8 + $0x200] sm:$0xf]  ;;  %v4749_v49 = vld [vmem:[#allocation8 + $0x2e4] sm:$0xf] }
  0xef   :  { %2486 = vmatpush.bf16.msrb.mxu3 %v3904_v53  ;;  %v5144_v53 = vpack.c.bf16 %v1698_v33, %v1698_v33  ;;  %v4669_v8 = vld [vmem:[#allocation8 + $0x64] sm:$0xf]  ;;  %v3988_v35 = vor.u32 %v4697_v23, %v3985_v24  ;;  %v4080_v11 = vor.u32 %v4723_v46, %v4079_v45  ;;  %v4193_v50 = vld [vmem:[#allocation8 + $0x2f0] sm:$0xf0]  ;;  %v4676_v23 = vld [vmem:[#allocation8 + $0x94] sm:$0xf0] }
  0xf0   :  { %3820 = vmatmul.msk.bf16.vlgmr.msra.gmra.mxu1 %vm1330_vm0, %v5088_v48  ;;  %v4685_v48 = vld [vmem:[#allocation8 + $0xe4] sm:$0xf]  ;;  %v1449_v32 = vpop.f32.mrf.mxu2  ;;  %v4196_v60 = vor.u32 %v4749_v49, %v4193_v50  ;;  %v4271_v46 = vld [vmem:[#allocation8 + $0x380] sm:$0xf] }
  0xf1   :  { %2500 = vmatpush.bf16.msrb.mxu1 %v4016_v34  ;;  %v3940_v36 = vor.u32 %v4685_v48, %v3937_v25  ;;  %v4673_v34 = vld [vmem:[#allocation8 + $0x84] sm:$0xf]  ;;  %v3841_v32 = vld [vmem:[#allocation8 + $0x30] sm:$0xf0] }
  0xf2   :  { %2512 = vmatpush.bf16.msrb.mxu2 %v4160_v55  ;;  %v3892_v2 = vor.u32 %v4673_v34, %v3889_v61  ;;  %v3953_v55 = vld [vmem:[#allocation8 + $0x110] sm:$0xf0]  ;;  %v3927_v61 = vld [vmem:[#allocation8 + $0xc8] sm:$0xf]  ;;  %v4737_v24 = vld [vmem:[#allocation8 + $0x284] sm:$0xf] }
  0xf3   :  { %2487 = vmatpush.bf16.msrb.mxu3 %v3888_v58  ;;  %v3908_v58 = vor.u32 %v4677_v51, %v3905_v52  ;;  %v4688_v52 = vld [vmem:[#allocation8 + $0xf4] sm:$0xf0] }
  0xf4   :  { %v3944_v34 = vor.u32 %v4688_v52, %v3943_v47  ;;  %v4771_v47 = vld [vmem:[#allocation8 + $0x38c] sm:$0xf0]  ;;  %v3863_v52 = vld [vmem:[#allocation8 + $0x48] sm:$0xf] }
  0xf5   :  { %2501 = vmatpush.bf16.msrb.mxu1 %v4000_v3  ;;  %v4127_v3 = vld [vmem:[#allocation8 + $0x260] sm:$0xf]  ;;  %v4272_v49 = vor.u32 %v4771_v47, %v4271_v46  ;;  %v4781_v46 = vld [vmem:[#allocation8 + $0x3e4] sm:$0xf]  ;;  %v4321_v47 = vld [vmem:[#allocation8 + $0x3f0] sm:$0xf0] }
  0xf6   :  { %2513 = vmatpush.bf16.msrb.mxu2 %v4144_v62  ;;  %v4128_v12 = vor.u32 %v4735_v4, %v4127_v3  ;;  %v4745_v62 = vld [vmem:[#allocation8 + $0x2c4] sm:$0xf]  ;;  %v4783_v3 = vld [vmem:[#allocation8 + $0x3ec] sm:$0xf0] }
  0xf7   :  { %2488 = vmatpush.bf16.msrb.mxu3 %v3872_v63  ;;  %v4705_v63 = vld [vmem:[#allocation8 + $0x184] sm:$0xf] }
  0xf8   :  { %v4020_v41 = vor.u32 %v4705_v63, %v4017_v0  ;;  %v4177_v63 = vld [vmem:[#allocation8 + $0x2d0] sm:$0xf0]  ;;  %v4684_v0 = vld [vmem:[#allocation8 + $0xd4] sm:$0xf0] }
  0xf9   :  { %2502 = vmatpush.bf16.msrb.mxu1 %v3984_v14  ;;  %v4001_v14 = vld [vmem:[#allocation8 + $0x170] sm:$0xf0] }
  0xfa   :  { %2514 = vmatpush.bf16.msrb.mxu2 %v4128_v12  ;;  %v4004_v48 = vor.u32 %v4701_v13, %v4001_v14  ;;  %v4680_v13 = vld [vmem:[#allocation8 + $0xb4] sm:$0xf0] }
  0xfb   :  { %2489 = vmatpush.bf16.msrb.mxu3 %v3856_v10  ;;  %v3873_v10 = vld [vmem:[#allocation8 + $0x70] sm:$0xf0] }
  0xfc   :  { %v1460_v1 = vpop.f32.mrf.mxu0  ;;  %v3876_v15 = vor.u32 %v4669_v8, %v3873_v10  ;;  %v3911_v8 = vld [vmem:[#allocation8 + $0xa8] sm:$0xf]  ;;  %v4741_v10 = vld [vmem:[#allocation8 + $0x2a4] sm:$0xf] }
  0xfd   :  { %2503 = vmatpush.bf16.msrb.mxu1 %v3968_v21  ;;  %v1473_v7 = vpop.f32.mrf.mxu1  ;;  %v1461_v40 = vadd.f32 %v1460_v1, %v1448_v30  ;;  %v4180_v1 = vor.u32 %v4745_v62, %v4177_v63  ;;  %v4055_v30 = vld [vmem:[#allocation8 + $0x1c8] sm:$0xf] }
  0xfe   :  { %v3847_v63 = vld [vmem:[#allocation8 + $0x28] sm:$0xf] }
  0xff   :  { %2490 = vmatpush.bf16.msrb.mxu3 %v3840_v17  ;;  %v4731_v17 = vld [vmem:[#allocation8 + $0x24c] sm:$0xf0]  ;;  %v1474_v56 = vadd.f32 %v1473_v7, %v1461_v40  ;;  %v3928_v7 = vor.u32 %v4684_v0, %v3927_v61  ;;  %v4708_v61 = vld [vmem:[#allocation8 + $0x194] sm:$0xf0]  ;;  %v4725_v0 = vld [vmem:[#allocation8 + $0x224] sm:$0xf] }
 0x100   :  { %v4112_v21 = vor.u32 %v4731_v17, %v4111_v16  ;;  %v4779_v16 = vld [vmem:[#allocation8 + $0x3cc] sm:$0xf0] }
 0x101   :  { %2504 = vmatpush.bf16.msrb.mxu1 %v3952_v37  ;;  %v4693_v37 = vld [vmem:[#allocation8 + $0x124] sm:$0xf] }
 0x102   :  { %2515 = vmatpush.bf16.msrb.mxu2 %v4112_v21 }
 0x103   :  { %2491 = vmatpush.bf16.msrb.mxu3 %v3824_v31  ;;  %v4661_v31 = vld [vmem:[#allocation8 + $0x24] sm:$0xf] }
 0x104   :  { %v1462_v25 = vpop.f32.mrf.mxu0  ;;  %v3844_v43 = vor.u32 %v4661_v31, %v3841_v32  ;;  %v4716_v31 = vld [vmem:[#allocation8 + $0x1d4] sm:$0xf0] }
 0x105   :  { %2549 = vmatpush.bf16.msra.mxu1 %v4068_v44  ;;  %v1486_v22 = vpop.f32.mrf.mxu3  ;;  %v1475_v33 = vpop.f32.mrf.mxu1  ;;  %v3825_v44 = vld [vmem:[#allocation8 + $0x10] sm:$0xf0]  ;;  %v4072_v25 = vor.u32 %v4720_v19, %v4071_v18  ;;  %v4660_v18 = vld [vmem:[#allocation8 + $0x14] sm:$0xf0]  ;;  %v4721_v19 = vld [vmem:[#allocation8 + $0x204] sm:$0xf] }
 0x106   :  { %2492 = vmatmul.bf16.vlgmr.msrb.gmra.mxu3 %v5144_v53  ;;  %v1487_v59 = vadd.f32 %v1486_v22, %v1474_v56  ;;  %v3912_v22 = vor.u32 %v4680_v13, %v3911_v8  ;;  %v4668_v56 = vld [vmem:[#allocation8 + $0x54] sm:$0xf0]  ;;  %v4239_v8 = vld [vmem:[#allocation8 + $0x340] sm:$0xf] }
 0x107   :  { %2536 = vmatpush.bf16.msra.mxu3 %v3940_v36  ;;  %v4096_v36 = vor.u32 %v4727_v9, %v4095_v28  ;;  %v4775_v28 = vld [vmem:[#allocation8 + $0x3ac] sm:$0xf0]  ;;  %v3864_v62 = vor.u32 %v4668_v56, %v3863_v52  ;;  %v3913_v56 = vld [vmem:[#allocation8 + $0xb8] sm:$0xf0] }
 0x108   :  { %v1499_v26 = vpop.f32.mrf.mxu2 }
 0x109   :  { %2550 = vmatpush.bf16.msra.mxu1 %v4052_v54  ;;  %2516 = vmatpush.bf16.msrb.mxu2 %v4096_v36  ;;  %v4689_v54 = vld [vmem:[#allocation8 + $0x104] sm:$0xf]  ;;  %v1500_v5 = vadd.f32 %v1499_v26, %v1487_v59  ;;  %v4145_v26 = vld [vmem:[#allocation8 + $0x290] sm:$0xf0]  ;;  %v3879_v36 = vld [vmem:[#allocation8 + $0x68] sm:$0xf] }
 0x10a   :  { %v4148_v32 = vor.u32 %v4737_v24, %v4145_v26  ;;  %v4767_v59 = vld [vmem:[#allocation8 + $0x36c] sm:$0xf0]  ;;  %v4686_v26 = vld [vmem:[#allocation8 + $0xec] sm:$0xf] }
 0x10b   :  { %2537 = vmatpush.bf16.msra.mxu3 %v3924_v20  ;;  %v3972_v20 = vor.u32 %v4693_v37, %v3969_v38  ;;  %v4733_v37 = vld [vmem:[#allocation8 + $0x264] sm:$0xf]  ;;  %v4129_v38 = vld [vmem:[#allocation8 + $0x270] sm:$0xf0]  ;;  %v4759_v24 = vld [vmem:[#allocation8 + $0x32c] sm:$0xf0] }
 0x10c   :  { %v4132_v45 = vor.u32 %v4733_v37, %v4129_v38 }
 0x10d   :  { %2551 = vmatpush.bf16.msra.mxu1 %v4036_v39  ;;  %v1488_v51 = vpop.f32.mrf.mxu3  ;;  %2517 = vmatpush.bf16.msrb.mxu2 %v4080_v11  ;;  %v3956_v39 = vor.u32 %v4689_v54, %v3953_v55  ;;  %v4712_v11 = vld [vmem:[#allocation8 + $0x1b4] sm:$0xf0]  ;;  %v4729_v54 = vld [vmem:[#allocation8 + $0x244] sm:$0xf]  ;;  %v4113_v55 = vld [vmem:[#allocation8 + $0x250] sm:$0xf0] }
 0x10f   :  { %2538 = vmatpush.bf16.msra.mxu3 %v3908_v58  ;;  %v3828_v58 = vor.u32 %v4657_v42, %v3825_v44  ;;  %v4672_v44 = vld [vmem:[#allocation8 + $0x74] sm:$0xf0] }
 0x110   :  { %v1501_v29 = vpop.f32.mrf.mxu2  ;;  %v3880_v51 = vor.u32 %v4672_v44, %v3879_v36  ;;  %v4682_v36 = vld [vmem:[#allocation8 + $0xcc] sm:$0xf]  ;;  %v3929_v44 = vld [vmem:[#allocation8 + $0xd8] sm:$0xf0] }
 0x111   :  { %2552 = vmatpush.bf16.msra.mxu1 %v4020_v41  ;;  %2562 = vmatpush.bf16.msra.mxu2 %v4196_v60  ;;  %v4161_v41 = vld [vmem:[#allocation8 + $0x2b0] sm:$0xf0]  ;;  %v4255_v29 = vld [vmem:[#allocation8 + $0x360] sm:$0xf]  ;;  %v3932_v52 = vor.u32 %v4682_v36, %v3929_v44  ;;  %v3849_v44 = vld [vmem:[#allocation8 + $0x38] sm:$0xf0] }
 0x112   :  { %v4164_v14 = vor.u32 %v4741_v10, %v4161_v41  ;;  %v4763_v10 = vld [vmem:[#allocation8 + $0x34c] sm:$0xf0]  ;;  %v4007_v41 = vld [vmem:[#allocation8 + $0x168] sm:$0xf] }
 0x113   :  { %2539 = vmatpush.bf16.msra.mxu3 %v3892_v2  ;;  %v4319_v2 = vld [vmem:[#allocation8 + $0x3e0] sm:$0xf]  ;;  %v4240_v13 = vor.u32 %v4763_v10, %v4239_v8  ;;  %v4714_v10 = vld [vmem:[#allocation8 + $0x1cc] sm:$0xf] }
 0x114   :  { %v4320_v4 = vor.u32 %v4783_v3, %v4319_v2 }
 0x115   :  { %2553 = vmatpush.bf16.msra.mxu1 %v4004_v48  ;;  %2563 = vmatpush.bf16.msra.mxu2 %v4180_v1  ;;  %v1512_v12 = vpop.f32.mrf.mxu3  ;;  %v3895_v48 = vld [vmem:[#allocation8 + $0x88] sm:$0xf]  ;;  %v4097_v1 = vld [vmem:[#allocation8 + $0x230] sm:$0xf0] }
 0x116   :  { %2523 = vmatpush.bf16.msrb.mxu0 %v4320_v4  ;;  %v1513_v17 = vadd.f32 %v1512_v12, %v1500_v5  ;;  %v3896_v33 = vor.u32 %v4676_v23, %v3895_v48  ;;  %v4664_v5 = vld [vmem:[#allocation8 + $0x34] sm:$0xf0]  ;;  %v4223_v23 = vld [vmem:[#allocation8 + $0x320] sm:$0xf] }
 0x117   :  { %2540 = vmatpush.bf16.msra.mxu3 %v3876_v15  ;;  %v4303_v15 = vld [vmem:[#allocation8 + $0x3c0] sm:$0xf]  ;;  %v4704_v12 = vld [vmem:[#allocation8 + $0x174] sm:$0xf0] }
 0x118   :  { %v4304_v57 = vor.u32 %v4779_v16, %v4303_v15  ;;  %v1699_v21 = vmax.f32 %v1513_v17, 0.0  ;;  %v3831_v15 = vld [vmem:[#allocation8 + $0x8] sm:$0xf]  ;;  %v3848_v17 = vor.u32 %v4664_v5, %v3847_v63  ;;  %v4008_v48 = vor.u32 %v4704_v12, %v4007_v41  ;;  %v4773_v5 = vld [vmem:[#allocation8 + $0x3a4] sm:$0xf] }
 0x119   :  { %2554 = vmatpush.bf16.msra.mxu1 %v3988_v35  ;;  %2564 = vmatpush.bf16.msra.mxu2 %v4164_v14 }
 0x11a   :  { %2524 = vmatpush.bf16.msrb.mxu0 %v4304_v57  ;;  %v5151_v9 = vpack.c.bf16 %v1699_v21, %v1699_v21  ;;  %v4081_v57 = vld [vmem:[#allocation8 + $0x210] sm:$0xf0]  ;;  %v3991_v21 = vld [vmem:[#allocation8 + $0x148] sm:$0xf] }
 0x11b   :  { %2541 = vmatpush.bf16.msra.mxu3 %v3860_v27  ;;  %v4287_v27 = vld [vmem:[#allocation8 + $0x3a0] sm:$0xf] }
 0x11c   :  { %v4288_v35 = vor.u32 %v4775_v28, %v4287_v27  ;;  %2505 = vmatmul.bf16.vlgmr.msrb.gmra.mxu1 %v5151_v9  ;;  %v5154_v42 = vpop.f32.mrf.mxu0  ;;  %v3945_v27 = vld [vmem:[#allocation8 + $0xf8] sm:$0xf0]  ;;  %v4224_v28 = vor.u32 %v4759_v24, %v4223_v23  ;;  %v4666_v23 = vld [vmem:[#allocation8 + $0x4c] sm:$0xf] }
 0x11d   :  { %2555 = vmatpush.bf16.msra.mxu1 %v3972_v20  ;;  %v1514_v40 = vpop.f32.mrf.mxu3  ;;  %2565 = vmatpush.bf16.msra.mxu2 %v4148_v32  ;;  %v4039_v20 = vld [vmem:[#allocation8 + $0x1a8] sm:$0xf]  ;;  %v5156_v50 = vpop.f32.mrf.mxu1  ;;  %v4696_v32 = vld [vmem:[#allocation8 + $0x134] sm:$0xf0] }
 0x11e   :  { %2525 = vmatpush.bf16.msrb.mxu0 %v4288_v35  ;;  %v4040_v60 = vor.u32 %v4712_v11, %v4039_v20  ;;  %v4207_v40 = vld [vmem:[#allocation8 + $0x300] sm:$0xf]  ;;  %v320_v20 = vperm.slane %v5124_v6, 2 }
 0x11f   :  { %2542 = vmatpush.bf16.msra.mxu3 %v3844_v43  ;;  %v4056_v43 = vor.u32 %v4716_v31, %v4055_v30  ;;  %v3832_v30 = vor.u32 %v4660_v18, %v3831_v15  ;;  %v3975_v31 = vld [vmem:[#allocation8 + $0x128] sm:$0xf]  ;;  %v4670_v15 = vld [vmem:[#allocation8 + $0x6c] sm:$0xf]  ;;  %v4769_v18 = vld [vmem:[#allocation8 + $0x384] sm:$0xf] }
 0x121   :  { %2556 = vmatpush.bf16.msra.mxu1 %v3956_v39  ;;  %2566 = vmatpush.bf16.msra.mxu2 %v4132_v45  ;;  %v4256_v39 = vor.u32 %v4767_v59, %v4255_v29  ;;  %v4305_v29 = vld [vmem:[#allocation8 + $0x3d0] sm:$0xf0]  ;;  %v1526_v59 = vadd.f32 %v5156_v50, %v320_v20  ;;  %v4057_v50 = vld [vmem:[#allocation8 + $0x1d8] sm:$0xf0]  ;;  %v4702_v20 = vld [vmem:[#allocation8 + $0x16c] sm:$0xf] }
 0x122   :  { %2526 = vmatpush.bf16.msrb.mxu0 %v4272_v49  ;;  %v4324_v49 = vor.u32 %v4781_v46, %v4321_v47  ;;  %v4241_v46 = vld [vmem:[#allocation8 + $0x350] sm:$0xf0] }
 0x123   :  { %2543 = vmatpush.bf16.msra.mxu3 %v3828_v58  ;;  %v4116_v58 = vor.u32 %v4729_v54, %v4113_v55  ;;  %v3959_v54 = vld [vmem:[#allocation8 + $0x108] sm:$0xf]  ;;  %v4692_v55 = vld [vmem:[#allocation8 + $0x114] sm:$0xf0] }
 0x124   :  { %v1553_v3 = vpop.f32.mrf.mxu0 }
 0x125   :  { %2601 = vmatpush.bf16.msrb.mxu1 %v4072_v25  ;;  %2567 = vmatpush.bf16.msra.mxu2 %v4116_v58  ;;  %v1527_v16 = vpop.f32.mrf.mxu1  ;;  %v4700_v25 = vld [vmem:[#allocation8 + $0x154] sm:$0xf0]  ;;  %v4777_v58 = vld [vmem:[#allocation8 + $0x3c4] sm:$0xf] }
 0x126   :  { %2544 = vmatmul.bf16.vlgmr.msra.gmra.mxu3 %v5144_v53  ;;  %2527 = vmatpush.bf16.msrb.mxu0 %v4256_v39  ;;  %v3992_v35 = vor.u32 %v4700_v25, %v3991_v21  ;;  %v4308_v39 = vor.u32 %v4777_v58, %v4305_v29  ;;  %v4060_v16 = vor.u32 %v4714_v10, %v4057_v50  ;;  %v4041_v21 = vld [vmem:[#allocation8 + $0x1b8] sm:$0xf0]  ;;  %v4757_v29 = vld [vmem:[#allocation8 + $0x324] sm:$0xf]  ;;  %v4209_v10 = vld [vmem:[#allocation8 + $0x310] sm:$0xf0] }
 0x127   :  { %2588 = vmatpush.bf16.msrb.mxu3 %v3944_v34  ;;  %v4023_v34 = vld [vmem:[#allocation8 + $0x188] sm:$0xf]  ;;  %v3865_v25 = vld [vmem:[#allocation8 + $0x58] sm:$0xf0]  ;;  %v4694_v50 = vld [vmem:[#allocation8 + $0x12c] sm:$0xf] }
 0x128   :  { %v4024_v4 = vor.u32 %v4708_v61, %v4023_v34  ;;  %v5160_v14 = vpop.f32.mrf.mxu2  ;;  %v4718_v34 = vld [vmem:[#allocation8 + $0x1ec] sm:$0xf]  ;;  %v4073_v61 = vld [vmem:[#allocation8 + $0x1f8] sm:$0xf0] }
 0x129   :  { %2602 = vmatpush.bf16.msrb.mxu1 %v4056_v43  ;;  %v5158_v2 = vpop.f32.mrf.mxu3  ;;  %v4755_v43 = vld [vmem:[#allocation8 + $0x30c] sm:$0xf0]  ;;  %v4076_v3 = vor.u32 %v4718_v34, %v4073_v61  ;;  %v3833_v58 = vld [vmem:[#allocation8 + $0x18] sm:$0xf0]  ;;  %v4698_v61 = vld [vmem:[#allocation8 + $0x14c] sm:$0xf] }
 0x12a   :  { %2528 = vmatpush.bf16.msrb.mxu0 %v4240_v13  ;;  %v4208_v45 = vor.u32 %v4755_v43, %v4207_v40  ;;  %v1539_v8 = vadd.f32 %v5158_v2, %v1526_v59  ;;  %v4225_v59 = vld [vmem:[#allocation8 + $0x330] sm:$0xf0] }
 0x12b   :  { %2589 = vmatpush.bf16.msrb.mxu3 %v3928_v7  ;;  %v4100_v7 = vor.u32 %v4725_v0, %v4097_v1  ;;  %v4674_v0 = vld [vmem:[#allocation8 + $0x8c] sm:$0xf] }
 0x12c   :  { %2557 = vmatmul.bf16.vlgmr.msra.gmra.mxu1 %v5151_v9  ;;  %v5163_v38 = vpop.f32.mrf.mxu0 }
 0x12d   :  { %2603 = vmatpush.bf16.msrb.mxu1 %v4040_v60  ;;  %2568 = vmatpush.bf16.msra.mxu2 %v4100_v7  ;;  %v4678_v60 = vld [vmem:[#allocation8 + $0xac] sm:$0xf]  ;;  %v4289_v7 = vld [vmem:[#allocation8 + $0x3b0] sm:$0xf0] }
 0x12e   :  { %2529 = vmatpush.bf16.msrb.mxu0 %v4224_v28  ;;  %v3916_v63 = vor.u32 %v4678_v60, %v3913_v56  ;;  %v4292_v41 = vor.u32 %v4773_v5, %v4289_v7  ;;  %v4658_v60 = vld [vmem:[#allocation8 + $0xc] sm:$0xf] }
 0x12f   :  { %2590 = vmatpush.bf16.msrb.mxu3 %v3912_v22  ;;  %v4084_v22 = vor.u32 %v4721_v19, %v4081_v57  ;;  %v4273_v19 = vld [vmem:[#allocation8 + $0x390] sm:$0xf0]  ;;  %v1552_v57 = vadd.f32 %v5154_v42, %v1539_v8  ;;  %v4753_v8 = vld [vmem:[#allocation8 + $0x304] sm:$0xf] }
 0x130   :  { %v1566_v11 = vpop.f32.mrf.mxu2  ;;  %v4276_v2 = vor.u32 %v4769_v18, %v4273_v19  ;;  %v4690_v19 = vld [vmem:[#allocation8 + $0x10c] sm:$0xf] }
 0x131   :  { %2604 = vmatpush.bf16.msrb.mxu1 %v4024_v4  ;;  %v1540_v37 = vpop.f32.mrf.mxu3  ;;  %2569 = vmatpush.bf16.msra.mxu2 %v4084_v22  ;;  %v3897_v4 = vld [vmem:[#allocation8 + $0x98] sm:$0xf0]  ;;  %v1565_v28 = vadd.f32 %v5160_v14, %v1552_v57 }
 0x132   :  { %2530 = vmatpush.bf16.msrb.mxu0 %v4208_v45  ;;  %v3900_v13 = vor.u32 %v4674_v0, %v3897_v4  ;;  %v4662_v37 = vld [vmem:[#allocation8 + $0x2c] sm:$0xf]  ;;  %v4761_v45 = vld [vmem:[#allocation8 + $0x344] sm:$0xf]  ;;  %v4009_v14 = vld [vmem:[#allocation8 + $0x178] sm:$0xf0] }
 0x133   :  { %2591 = vmatpush.bf16.msrb.mxu3 %v3896_v33  ;;  %v3948_v33 = vor.u32 %v4686_v26, %v3945_v27  ;;  %v4765_v26 = vld [vmem:[#allocation8 + $0x364] sm:$0xf]  ;;  %v4257_v27 = vld [vmem:[#allocation8 + $0x370] sm:$0xf0]  ;;  %v4012_v56 = vor.u32 %v4702_v20, %v4009_v14  ;;  %v4748_v4 = vld [vmem:[#allocation8 + $0x2d4] sm:$0xf0] }
 0x134   :  { %v1605_v1 = vpop.f32.mrf.mxu0  ;;  %v4260_v42 = vor.u32 %v4765_v26, %v4257_v27  ;;  %v3961_v57 = vld [vmem:[#allocation8 + $0x118] sm:$0xf0]  ;;  %v4736_v26 = vld [vmem:[#allocation8 + $0x274] sm:$0xf0]  ;;  %v4750_v14 = vld [vmem:[#allocation8 + $0x2ec] sm:$0xf] }
 0x135   :  { %2605 = vmatpush.bf16.msrb.mxu1 %v4008_v48  ;;  %v4710_v48 = vld [vmem:[#allocation8 + $0x1ac] sm:$0xf] }
 0x136   :  { %2575 = vmatpush.bf16.msra.mxu0 %v4324_v49  ;;  %v4044_v24 = vor.u32 %v4710_v48, %v4041_v21  ;;  %v4244_v49 = vor.u32 %v4761_v45, %v4241_v46  ;;  %v4151_v21 = vld [vmem:[#allocation8 + $0x288] sm:$0xf] }
 0x137   :  { %2592 = vmatpush.bf16.msrb.mxu3 %v3880_v51  ;;  %v3976_v51 = vor.u32 %v4696_v32, %v3975_v31  ;;  %v4025_v31 = vld [vmem:[#allocation8 + $0x198] sm:$0xf0] }
 0x139   :  { %2606 = vmatpush.bf16.msrb.mxu1 %v3992_v35 }
 0x13a   :  { %2576 = vmatpush.bf16.msra.mxu0 %v4308_v39  ;;  %v3993_v39 = vld [vmem:[#allocation8 + $0x158] sm:$0xf0] }
 0x13b   :  { %2593 = vmatpush.bf16.msrb.mxu3 %v3864_v62  ;;  %v3960_v62 = vor.u32 %v4692_v55, %v3959_v54  ;;  %v4199_v54 = vld [vmem:[#allocation8 + $0x2e8] sm:$0xf]  ;;  %v4752_v55 = vld [vmem:[#allocation8 + $0x2f4] sm:$0xf0]  ;;  %v3996_v5 = vor.u32 %v4698_v61, %v3993_v39 }
 0x13c   :  { %v4200_v0 = vor.u32 %v4752_v55, %v4199_v54  ;;  %v4746_v55 = vld [vmem:[#allocation8 + $0x2cc] sm:$0xf] }
 0x13d   :  { %2607 = vmatpush.bf16.msrb.mxu1 %v3976_v51  ;;  %v1577_v12 = vpop.f32.mrf.mxu1 }
 0x13e   :  { %2577 = vmatpush.bf16.msra.mxu0 %v4292_v41  ;;  %v1578_v35 = vadd.f32 %v1577_v12, %v1565_v28  ;;  %v3977_v41 = vld [vmem:[#allocation8 + $0x138] sm:$0xf0] }
 0x13f   :  { %2594 = vmatpush.bf16.msrb.mxu3 %v3848_v17  ;;  %v3881_v17 = vld [vmem:[#allocation8 + $0x78] sm:$0xf0]  ;;  %v3980_v18 = vor.u32 %v4694_v50, %v3977_v41  ;;  %v4295_v41 = vld [vmem:[#allocation8 + $0x3a8] sm:$0xf] }
 0x140   :  { %v3884_v22 = vor.u32 %v4670_v15, %v3881_v17  ;;  %v5172_v32 = vpop.f32.mrf.mxu0  ;;  %v4744_v17 = vld [vmem:[#allocation8 + $0x2b4] sm:$0xf0]  ;;  %v4153_v50 = vld [vmem:[#allocation8 + $0x298] sm:$0xf0] }
 0x141   :  { %2608 = vmatpush.bf16.msrb.mxu1 %v3960_v62 }
 0x142   :  { %2578 = vmatpush.bf16.msra.mxu0 %v4276_v2  ;;  %v4740_v2 = vld [vmem:[#allocation8 + $0x294] sm:$0xf0] }
 0x143   :  { %2595 = vmatpush.bf16.msrb.mxu3 %v3832_v30  ;;  %v4706_v30 = vld [vmem:[#allocation8 + $0x18c] sm:$0xf] }
 0x144   :  { %2609 = vmatmul.bf16.vlgmr.msrb.gmra.mxu1 %v5151_v9  ;;  %v4028_v43 = vor.u32 %v4706_v30, %v4025_v31  ;;  %v4119_v31 = vld [vmem:[#allocation8 + $0x248] sm:$0xf] }
 0x145   :  { %2653 = vmatpush.bf16.msra.mxu1 %v4076_v3  ;;  %v1579_v36 = vpop.f32.mrf.mxu1  ;;  %v4183_v3 = vld [vmem:[#allocation8 + $0x2c8] sm:$0xf] }
 0x146   :  { %2596 = vmatmul.bf16.vlgmr.msrb.gmra.mxu3 %v5144_v53  ;;  %2579 = vmatpush.bf16.msra.mxu0 %v4260_v42  ;;  %v4184_v15 = vor.u32 %v4748_v4, %v4183_v3  ;;  %v4728_v36 = vld [vmem:[#allocation8 + $0x234] sm:$0xf0]  ;;  %v4311_v3 = vld [vmem:[#allocation8 + $0x3c8] sm:$0xf] }
 0x147   :  { %2640 = vmatpush.bf16.msra.mxu3 %v3948_v33  ;;  %v3868_v33 = vor.u32 %v4666_v23, %v3865_v25  ;;  %v3964_v23 = vor.u32 %v4690_v19, %v3961_v57  ;;  %v4135_v25 = vld [vmem:[#allocation8 + $0x268] sm:$0xf]  ;;  %v4780_v4 = vld [vmem:[#allocation8 + $0x3d4] sm:$0xf0] }
 0x148   :  { %v1616_v11 = vpop.f32.mrf.mxu2  ;;  %v1631_v62 = vpop.f32.mrf.mxu0  ;;  %v4136_v30 = vor.u32 %v4736_v26, %v4135_v25  ;;  %v4772_v19 = vld [vmem:[#allocation8 + $0x394] sm:$0xf0]  ;;  %v4726_v26 = vld [vmem:[#allocation8 + $0x22c] sm:$0xf] }
 0x149   :  { %2654 = vmatpush.bf16.msra.mxu1 %v4060_v16  ;;  %v1590_v40 = vpop.f32.mrf.mxu3  ;;  %v4167_v16 = vld [vmem:[#allocation8 + $0x2a8] sm:$0xf] }
 0x14a   :  { %v1591_v47 = vadd.f32 %v1590_v40, %v1578_v35  ;;  %2580 = vmatpush.bf16.msra.mxu0 %v4244_v49  ;;  %v4168_v48 = vor.u32 %v4744_v17, %v4167_v16  ;;  %v4734_v16 = vld [vmem:[#allocation8 + $0x26c] sm:$0xf]  ;;  %v4137_v17 = vld [vmem:[#allocation8 + $0x278] sm:$0xf0] }
 0x14b   :  { %2641 = vmatpush.bf16.msra.mxu3 %v3932_v52  ;;  %v3852_v52 = vor.u32 %v4662_v37, %v3849_v44  ;;  %v4140_v57 = vor.u32 %v4734_v16, %v4137_v17 }
 0x14c   :  { %v1604_v51 = vadd.f32 %v5163_v38, %v1591_v47  ;;  %v3836_v38 = vor.u32 %v4658_v60, %v3833_v58  ;;  %v4087_v47 = vld [vmem:[#allocation8 + $0x208] sm:$0xf]  ;;  %v4185_v60 = vld [vmem:[#allocation8 + $0x2d8] sm:$0xf0] }
 0x14d   :  { %2655 = vmatpush.bf16.msra.mxu1 %v4044_v24  ;;  %v4152_v24 = vor.u32 %v4740_v2, %v4151_v21  ;;  %v4188_v39 = vor.u32 %v4746_v55, %v4185_v60  ;;  %v4730_v21 = vld [vmem:[#allocation8 + $0x24c] sm:$0xf]  ;;  %v4121_v2 = vld [vmem:[#allocation8 + $0x258] sm:$0xf0]  ;;  %v5190_v60 = vld [vmem:[#allocation10] sm:$0xf] }
 0x14e   :  { %v1700_v34 = vmax.f32 %v1604_v51, 0.0  ;;  %v4281_v55 = vld [vmem:[#allocation8 + $0x398] sm:$0xf0] }
 0x14f   :  { %2642 = vmatpush.bf16.msra.mxu3 %v3916_v63  ;;  %v4228_v63 = vor.u32 %v4757_v29, %v4225_v59  ;;  %v4327_v29 = vld [vmem:[#allocation8 + $0x3e8] sm:$0xf]  ;;  %v4784_v59 = vld [vmem:[#allocation8 + $0x3f4] sm:$0xf0] }
 0x150   :  { %v5175_v1 = vpack.c.bf16 %v1700_v34, %v1700_v34  ;;  %v1618_v12 = vpop.f32.mrf.mxu2  ;;  %v4328_v62 = vor.u32 %v4784_v59, %v4327_v29  ;;  %v4265_v29 = vld [vmem:[#allocation8 + $0x378] sm:$0xf0] }
 0x151   :  { %2656 = vmatpush.bf16.msra.mxu1 %v4028_v43  ;;  %v1592_v7 = vpop.f32.mrf.mxu3  ;;  %2581 = vmatpush.bf16.msra.mxu0 %v4228_v63  ;;  %v4742_v63 = vld [vmem:[#allocation8 + $0x2ac] sm:$0xf]  ;;  %v4776_v12 = vld [vmem:[#allocation8 + $0x3b4] sm:$0xf0] }
 0x152   :  { %2518 = vmatmul.bf16.vlgmr.msrb.gmra.mxu2 %v5175_v1 }
 0x153   :  { %2643 = vmatpush.bf16.msra.mxu3 %v3900_v13  ;;  %v4212_v13 = vor.u32 %v4753_v8, %v4209_v10  ;;  %2614 = vmatpush.bf16.msrb.mxu2 %v4200_v0  ;;  %v4169_v0 = vld [vmem:[#allocation8 + $0x2b8] sm:$0xf0]  ;;  %v4312_v8 = vor.u32 %v4780_v4, %v4311_v3  ;;  %v4738_v10 = vld [vmem:[#allocation8 + $0x28c] sm:$0xf] }
 0x154   :  { %v4758_v4 = vld [vmem:[#allocation8 + $0x32c] sm:$0xf] }
 0x155   :  { %2657 = vmatpush.bf16.msra.mxu1 %v4012_v56  ;;  %2582 = vmatpush.bf16.msra.mxu0 %v4212_v13  ;;  %v4156_v13 = vor.u32 %v4738_v10, %v4153_v50  ;;  %v4217_v10 = vld [vmem:[#allocation8 + $0x318] sm:$0xf0] }
 0x157   :  { %2644 = vmatpush.bf16.msra.mxu3 %v3884_v22  ;;  %2615 = vmatpush.bf16.msrb.mxu2 %v4184_v15  ;;  %v321_v22 = vperm.slane %v5124_v6, 3  ;;  %v4296_v15 = vor.u32 %v4776_v12, %v4295_v41 }
 0x159   :  { %2658 = vmatpush.bf16.msra.mxu1 %v3996_v5  ;;  %v1617_v27 = vadd.f32 %v1616_v11, %v321_v22  ;;  %v4201_v11 = vld [vmem:[#allocation8 + $0x2f8] sm:$0xf0]  ;;  %v4172_v5 = vor.u32 %v4742_v63, %v4169_v0  ;;  %v4263_v22 = vld [vmem:[#allocation8 + $0x368] sm:$0xf] }
 0x15b   :  { %2645 = vmatpush.bf16.msra.mxu3 %v3868_v33  ;;  %2616 = vmatpush.bf16.msrb.mxu2 %v4168_v48  ;;  %v1630_v42 = vadd.f32 %v5172_v32, %v1617_v27  ;;  %v4103_v33 = vld [vmem:[#allocation8 + $0x228] sm:$0xf]  ;;  %v4105_v27 = vld [vmem:[#allocation8 + $0x238] sm:$0xf0] }
 0x15c   :  { %v4104_v46 = vor.u32 %v4728_v36, %v4103_v33  ;;  %v4231_v33 = vld [vmem:[#allocation8 + $0x328] sm:$0xf]  ;;  %v4760_v36 = vld [vmem:[#allocation8 + $0x334] sm:$0xf0] }
 0x15d   :  { %2659 = vmatpush.bf16.msra.mxu1 %v3980_v18  ;;  %v1642_v28 = vpop.f32.mrf.mxu1  ;;  %v4279_v18 = vld [vmem:[#allocation8 + $0x388] sm:$0xf] }
 0x15e   :  { %v1643_v37 = vadd.f32 %v1642_v28, %v1630_v42  ;;  %v4280_v48 = vor.u32 %v4772_v19, %v4279_v18  ;;  %v4247_v28 = vld [vmem:[#allocation8 + $0x348] sm:$0xf]  ;;  %v4792_v18 = vld [vmem:[#allocation11 + $0x38] sm:$0xff] }
 0x15f   :  { %2646 = vmatpush.bf16.msra.mxu3 %v3852_v52  ;;  %2617 = vmatpush.bf16.msrb.mxu2 %v4152_v24  ;;  %v4204_v52 = vor.u32 %v4750_v14, %v4201_v11  ;;  %v4124_v24 = vor.u32 %v4730_v21, %v4121_v2  ;;  %v4778_v14 = vld [vmem:[#allocation8 + $0x3cc] sm:$0xf]  ;;  %v4313_v11 = vld [vmem:[#allocation8 + $0x3d8] sm:$0xf0] }
 0x160   :  { %v1681_v6 = vpop.f32.mrf.mxu0 }
 0x161   :  { %2660 = vmatpush.bf16.msra.mxu1 %v3964_v23  ;;  %v4768_v23 = vld [vmem:[#allocation8 + $0x374] sm:$0xf0] }
 0x162   :  { %2570 = vmatmul.bf16.vlgmr.msra.gmra.mxu2 %v5175_v1  ;;  %v4264_v25 = vor.u32 %v4768_v23, %v4263_v22  ;;  %v4790_v22 = vld [vmem:[#allocation11 + $0x28] sm:$0xff] }
 0x163   :  { %2647 = vmatpush.bf16.msra.mxu3 %v3836_v38  ;;  %2618 = vmatpush.bf16.msrb.mxu2 %v4136_v30  ;;  %v4764_v30 = vld [vmem:[#allocation8 + $0x354] sm:$0xf0] }
 0x164   :  { %2661 = vmatmul.bf16.vlgmr.msra.gmra.mxu1 %v5151_v9  ;;  %v4724_v9 = vld [vmem:[#allocation8 + $0x214] sm:$0xf0]  ;;  %v4248_v42 = vor.u32 %v4764_v30, %v4247_v28  ;;  %v4800_v28 = vld [vmem:[#allocation11 + $0x78] sm:$0xff] }
 0x165   :  { %v1644_v40 = vpop.f32.mrf.mxu1  ;;  %v4088_v51 = vor.u32 %v4724_v9, %v4087_v47  ;;  %v4329_v47 = vld [vmem:[#allocation8 + $0x3f8] sm:$0xf0]  ;;  %2973 = vmatpush.bf16.msrb.mxu1 %v4800_v28  ;;  %v4787_v30 = vld [vmem:[#allocation11 + $0x10] sm:$0xff] }
 0x166   :  { %2648 = vmatmul.bf16.vlgmr.msra.gmra.mxu3 %v5144_v53  ;;  %v4732_v53 = vld [vmem:[#allocation8 + $0x254] sm:$0xf0]  ;;  %v4232_v40 = vor.u32 %v4760_v36, %v4231_v33  ;;  %v1839_v36 = vperm.slane %v5190_v60, 3 }
 0x167   :  { %v4120_v35 = vor.u32 %v4732_v53, %v4119_v31  ;;  %v4108_v53 = vor.u32 %v4726_v26, %v4105_v27  ;;  %2960 = vmatpush.bf16.msrb.mxu3 %v4792_v18  ;;  %v4788_v27 = vld [vmem:[#allocation11 + $0x18] sm:$0xff]  ;;  %v4810_v18 = vld [vmem:[#allocation11 + $0xc8] sm:$0xff] }
 0x168   :  { %v1668_v45 = vpop.f32.mrf.mxu2  ;;  %v1683_v32 = vpop.f32.mrf.mxu0 }
 0x169   :  { %v1655_v43 = vpop.f32.mrf.mxu3  ;;  %2619 = vmatpush.bf16.msrb.mxu2 %v4120_v35  ;;  %v4089_v35 = vld [vmem:[#allocation8 + $0x218] sm:$0xf0]  ;;  %v4316_v32 = vor.u32 %v4778_v14, %v4313_v11  ;;  %v4794_v14 = vld [vmem:[#allocation11 + $0x48] sm:$0xff] }
 0x16a   :  { %v1656_v44 = vadd.f32 %v1655_v43, %v1643_v37  ;;  %v4215_v43 = vld [vmem:[#allocation8 + $0x308] sm:$0xf]  ;;  %v4806_v11 = vld [vmem:[#allocation11 + $0xa8] sm:$0xff] }
 0x16c   :  { %v1669_v20 = vadd.f32 %v1668_v45, %v1656_v44  ;;  %v4756_v44 = vld [vmem:[#allocation8 + $0x314] sm:$0xf0] }
 0x16d   :  { %2620 = vmatpush.bf16.msrb.mxu2 %v4104_v46  ;;  %v1694_v54 = vpop.f32.mrf.mxu1  ;;  %v4782_v46 = vld [vmem:[#allocation8 + $0x3ec] sm:$0xf]  ;;  %v4216_v9 = vor.u32 %v4756_v44, %v4215_v43 }
 0x16e   :  { %v1682_v49 = vadd.f32 %v1681_v6, %v1669_v20  ;;  %v4722_v6 = vld [vmem:[#allocation8 + $0x20c] sm:$0xf]  ;;  %v4332_v20 = vor.u32 %v4782_v46, %v4329_v47  ;;  %v4807_v46 = vld [vmem:[#allocation11 + $0xb0] sm:$0xff] }
 0x16f   :  { %v4092_v37 = vor.u32 %v4722_v6, %v4089_v35  ;;  %v4785_v6 = vld [vmem:[#allocation11] sm:$0xff] }
 0x170   :  { %v1695_v56 = vadd.f32 %v1694_v54, %v1682_v49  ;;  %v1670_v34 = vpop.f32.mrf.mxu2  ;;  %v4774_v49 = vld [vmem:[#allocation8 + $0x3ac] sm:$0xf]  ;;  %v4797_v35 = vld [vmem:[#allocation11 + $0x60] sm:$0xff] }
 0x171   :  { %v1657_v58 = vpop.f32.mrf.mxu3  ;;  %2621 = vmatpush.bf16.msrb.mxu2 %v4088_v51  ;;  %v4297_v51 = vld [vmem:[#allocation8 + $0x3b8] sm:$0xf0]  ;;  %v4770_v54 = vld [vmem:[#allocation8 + $0x38c] sm:$0xf] }
 0x172   :  { %v1701_v61 = vmax.f32 %v1695_v56, 0.0  ;;  %v4284_v56 = vor.u32 %v4770_v54, %v4281_v55  ;;  %v1836_v58 = vperm.slane %v5190_v60, 0  ;;  %v4804_v55 = vld [vmem:[#allocation11 + $0x98] sm:$0xff] }
 0x174   :  { %v5183_v38 = vpack.c.bf16 %v1701_v61, %v1701_v61  ;;  %2622 = vmatmul.bf16.vlgmr.msrb.gmra.mxu2 %v5175_v1  ;;  %v4762_v61 = vld [vmem:[#allocation8 + $0x34c] sm:$0xf] }
 0x175   :  { %2666 = vmatpush.bf16.msra.mxu2 %v4204_v52  ;;  %v1696_v7 = vpop.f32.mrf.mxu1  ;;  %v4300_v52 = vor.u32 %v4774_v49, %v4297_v51  ;;  %v4793_v49 = vld [vmem:[#allocation11 + $0x40] sm:$0xff] }
 0x176   :  { %2531 = vmatmul.bf16.vlgmr.msrb.gmra.mxu0 %v5183_v38  ;;  %v4805_v51 = vld [vmem:[#allocation11 + $0xa0] sm:$0xff] }
 0x177   :  { %2627 = vmatpush.bf16.msrb.mxu0 %v4328_v62 }
 0x179   :  { %2667 = vmatpush.bf16.msra.mxu2 %v4188_v39  ;;  %v4249_v39 = vld [vmem:[#allocation8 + $0x358] sm:$0xf0] }
 0x17a   :  { %v4252_v3 = vor.u32 %v4762_v61, %v4249_v39  ;;  %v4801_v61 = vld [vmem:[#allocation11 + $0x80] sm:$0xff]  ;;  %v4816_v39 = vld [vmem:[#allocation11 + $0xf8] sm:$0xff] }
 0x17b   :  { %2628 = vmatpush.bf16.msrb.mxu0 %v4312_v8  ;;  %v4754_v8 = vld [vmem:[#allocation8 + $0x30c] sm:$0xf] }
 0x17c   :  { %v4220_v12 = vor.u32 %v4754_v8, %v4217_v10  ;;  %v4813_v8 = vld [vmem:[#allocation11 + $0xe0] sm:$0xff] }
 0x17d   :  { %2668 = vmatpush.bf16.msra.mxu2 %v4172_v5  ;;  %v4233_v5 = vld [vmem:[#allocation8 + $0x338] sm:$0xf0] }
 0x17e   :  { %v4236_v7 = vor.u32 %v4758_v4, %v4233_v5  ;;  %v4814_v5 = vld [vmem:[#allocation11 + $0xe8] sm:$0xff] }
 0x17f   :  { %2629 = vmatpush.bf16.msrb.mxu0 %v4296_v15 }
 0x181   :  { %2669 = vmatpush.bf16.msra.mxu2 %v4156_v13  ;;  %v1837_v13 = vperm.slane %v5190_v60, 1 }
 0x183   :  { %2630 = vmatpush.bf16.msrb.mxu0 %v4280_v48  ;;  %v4791_v48 = vld [vmem:[#allocation11 + $0x30] sm:$0xff] }
 0x184   :  { %2961 = vmatpush.bf16.msrb.mxu3 %v4791_v48 }
 0x185   :  { %2670 = vmatpush.bf16.msra.mxu2 %v4140_v57  ;;  %v1838_v57 = vperm.slane %v5190_v60, 2  ;;  %v4803_v60 = vld [vmem:[#allocation11 + $0x90] sm:$0xff] }
 0x186   :  { %2583 = vmatmul.bf16.vlgmr.msra.gmra.mxu0 %v5183_v38 }
 0x187   :  { %2631 = vmatpush.bf16.msrb.mxu0 %v4264_v25  ;;  %v4789_v25 = vld [vmem:[#allocation11 + $0x20] sm:$0xff] }
 0x188   :  { %2962 = vmatpush.bf16.msrb.mxu3 %v4790_v22 }
 0x189   :  { %v2493_v31 = vpop.f32.mrf.mxu3  ;;  %2671 = vmatpush.bf16.msra.mxu2 %v4124_v24 }
 0x18a   :  { %v2494_v34 = vadd.f32 %v2493_v31, %v1836_v58  ;;  %v4799_v31 = vld [vmem:[#allocation11 + $0x70] sm:$0xff] }
 0x18b   :  { %2632 = vmatpush.bf16.msrb.mxu0 %v4248_v42  ;;  %2974 = vmatpush.bf16.msrb.mxu1 %v4799_v31  ;;  %v4798_v42 = vld [vmem:[#allocation11 + $0x68] sm:$0xff] }
 0x18c   :  { %2963 = vmatpush.bf16.msrb.mxu3 %v4789_v25 }
 0x18d   :  { %2672 = vmatpush.bf16.msra.mxu2 %v4108_v53  ;;  %v4786_v53 = vld [vmem:[#allocation11 + $0x8] sm:$0xff] }
 0x18f   :  { %2633 = vmatpush.bf16.msrb.mxu0 %v4232_v40  ;;  %2975 = vmatpush.bf16.msrb.mxu1 %v4798_v42  ;;  %v4808_v40 = vld [vmem:[#allocation11 + $0xb8] sm:$0xff] }
 0x190   :  { %2964 = vmatpush.bf16.msrb.mxu3 %v4788_v27 }
 0x191   :  { %v2495_v45 = vpop.f32.mrf.mxu3  ;;  %2673 = vmatpush.bf16.msra.mxu2 %v4092_v37  ;;  %v4796_v37 = vld [vmem:[#allocation11 + $0x58] sm:$0xff] }
 0x192   :  { %v4795_v45 = vld [vmem:[#allocation11 + $0x50] sm:$0xff] }
 0x193   :  { %2634 = vmatpush.bf16.msrb.mxu0 %v4216_v9  ;;  %2976 = vmatpush.bf16.msrb.mxu1 %v4797_v35 }
 0x194   :  { %2674 = vmatmul.bf16.vlgmr.msra.gmra.mxu2 %v5175_v1  ;;  %v4766_v1 = vld [vmem:[#allocation8 + $0x36c] sm:$0xf]  ;;  %2965 = vmatpush.bf16.msrb.mxu3 %v4787_v30 }
 0x195   :  { %v4268_v59 = vor.u32 %v4766_v1, %v4265_v29  ;;  %2986 = vmatpush.bf16.msrb.mxu2 %v4808_v40  ;;  %v4802_v1 = vld [vmem:[#allocation11 + $0x88] sm:$0xff] }
 0x196   :  { %2635 = vmatmul.bf16.vlgmr.msrb.gmra.mxu0 %v5183_v38 }
 0x197   :  { %2679 = vmatpush.bf16.msra.mxu0 %v4332_v20  ;;  %2977 = vmatpush.bf16.msrb.mxu1 %v4796_v37 }
 0x198   :  { %2966 = vmatpush.bf16.msrb.mxu3 %v4786_v53 }
 0x199   :  { %v2506_v62 = vpop.f32.mrf.mxu1  ;;  %2987 = vmatpush.bf16.msrb.mxu2 %v4807_v46 }
 0x19a   :  { %v5193_v0 = vadd.f32 %v2506_v62, %v2494_v34 }
 0x19b   :  { %2680 = vmatpush.bf16.msra.mxu0 %v4316_v32  ;;  %2978 = vmatpush.bf16.msrb.mxu1 %v4795_v45 }
 0x19c   :  { %2967 = vmatpush.bf16.msrb.mxu3 %v4785_v6 }
 0x19d   :  { %2988 = vmatpush.bf16.msrb.mxu2 %v4806_v11 }
 0x19f   :  { %2681 = vmatpush.bf16.msra.mxu0 %v4300_v52  ;;  %2979 = vmatpush.bf16.msrb.mxu1 %v4794_v14 }
 0x1a1   :  { %v2508_v50 = vpop.f32.mrf.mxu1  ;;  %2989 = vmatpush.bf16.msrb.mxu2 %v4805_v51 }
 0x1a3   :  { %2682 = vmatpush.bf16.msra.mxu0 %v4284_v56  ;;  %2980 = vmatpush.bf16.msrb.mxu1 %v4793_v49 }
 0x1a5   :  { %2990 = vmatpush.bf16.msrb.mxu2 %v4804_v55 }
 0x1a7   :  { %2683 = vmatpush.bf16.msra.mxu0 %v4268_v59 }
 0x1a9   :  { %v2545_v63 = vpop.f32.mrf.mxu3  ;;  %v2558_v16 = vpop.f32.mrf.mxu1  ;;  %2991 = vmatpush.bf16.msrb.mxu2 %v4803_v60 }
 0x1aa   :  { %v2546_v15 = vadd.f32 %v2545_v63, %v1837_v13 }
 0x1ab   :  { %2684 = vmatpush.bf16.msra.mxu0 %v4252_v3  ;;  %v4815_v3 = vld [vmem:[#allocation11 + $0xf0] sm:$0xff] }
 0x1ac   :  { %v5196_v17 = vadd.f32 %v2558_v16, %v2546_v15  ;;  %v4811_v15 = vld [vmem:[#allocation11 + $0xd0] sm:$0xff] }
 0x1ad   :  { %2992 = vmatpush.bf16.msrb.mxu2 %v4802_v1 }
 0x1af   :  { %2685 = vmatpush.bf16.msra.mxu0 %v4236_v7 }
 0x1b1   :  { %v2547_v41 = vpop.f32.mrf.mxu3  ;;  %v2560_v19 = vpop.f32.mrf.mxu1  ;;  %2993 = vmatpush.bf16.msrb.mxu2 %v4801_v61 }
 0x1b2   :  { %v4812_v41 = vld [vmem:[#allocation11 + $0xd8] sm:$0xff] }
 0x1b3   :  { %2686 = vmatpush.bf16.msra.mxu0 %v4220_v12 }
 0x1b6   :  { %2687 = vmatmul.bf16.vlgmr.msra.gmra.mxu0 %v5183_v38 }
 0x1b7   :  { %2999 = vmatpush.bf16.msrb.mxu0 %v4816_v39 }
 0x1bb   :  { %3000 = vmatpush.bf16.msrb.mxu0 %v4815_v3 }
 0x1bf   :  { %3001 = vmatpush.bf16.msrb.mxu0 %v4814_v5 }
 0x1c1   :  { %v2610_v23 = vpop.f32.mrf.mxu1 }
 0x1c3   :  { %3002 = vmatpush.bf16.msrb.mxu0 %v4813_v8 }
 0x1c7   :  { %3003 = vmatpush.bf16.msrb.mxu0 %v4812_v41 }
 0x1c9   :  { %v2597_v21 = vpop.f32.mrf.mxu3  ;;  %v2612_v38 = vpop.f32.mrf.mxu1 }
 0x1ca   :  { %v2598_v2 = vadd.f32 %v2597_v21, %v1838_v57  ;;  %v4809_v57 = vld [vmem:[#allocation11 + $0xc0] sm:$0xff] }
 0x1cb   :  { %3004 = vmatpush.bf16.msrb.mxu0 %v4811_v15 }
 0x1cc   :  { %v5200_v24 = vadd.f32 %v2610_v23, %v2598_v2 }
 0x1cf   :  { %3005 = vmatpush.bf16.msrb.mxu0 %v4810_v18 }
 0x1d1   :  { %v2599_v26 = vpop.f32.mrf.mxu3 }
 0x1d3   :  { %3006 = vmatpush.bf16.msrb.mxu0 %v4809_v57 }
 0x1d5   :  { %v2519_v33 = vpop.f32.mrf.mxu2 }
 0x1d6   :  { %v2520_v58 = vadd.f32 %v2519_v33, %v5193_v0 }
 0x1dd   :  { %v2521_v9 = vpop.f32.mrf.mxu2 }
 0x1e1   :  { %v2662_v47 = vpop.f32.mrf.mxu1 }
 0x1e5   :  { %v2571_v54 = vpop.f32.mrf.mxu2 }
 0x1e6   :  { %v2572_v0 = vadd.f32 %v2571_v54, %v5196_v17 }
 0x1e9   :  { %v2649_v43 = vpop.f32.mrf.mxu3  ;;  %v2664_v52 = vpop.f32.mrf.mxu1 }
 0x1ea   :  { %v2650_v44 = vadd.f32 %v2649_v43, %v1839_v36  ;;  %v4828_v36 = vld [vmem:[%s5221_s6] ss:$0 sm:$0xff] }
 0x1ec   :  { %v5203_v20 = vadd.f32 %v2662_v47, %v2650_v44 }
 0x1ed   :  { %v2573_v56 = vpop.f32.mrf.mxu2 }
 0x1f1   :  { %v2651_v32 = vpop.f32.mrf.mxu3 }
 0x1f3   :  { %v2532_v29 = vpop.f32.mrf.mxu0 }
 0x1f4   :  { %v2533_v59 = vadd.f32 %v2532_v29, %v2520_v58 }
 0x1f6   :  { %v2692_v34 = vmax.f32 %v2533_v59, 0.0 }
 0x1f7   :  { %v2623_v62 = vpop.f32.mrf.mxu2 }
 0x1f8   :  { %v2696_v63 = vpack.c.bf16 %v2692_v34, %v2692_v34  ;;  %v2624_v19 = vadd.f32 %v2623_v62, %v5200_v24 }
 0x1fa   :  { %2968 = vmatmul.bf16.vlgmr.msrb.gmra.mxu3 %v2696_v63 }
 0x1fb   :  { %v2534_v4 = vpop.f32.mrf.mxu0 }
 0x1ff   :  { %v2625_v7 = vpop.f32.mrf.mxu2 }
 0x203   :  { %v2584_v10 = vpop.f32.mrf.mxu0 }
 0x204   :  { %v2585_v50 = vadd.f32 %v2584_v10, %v2572_v0 }
 0x206   :  { %v2693_v12 = vmax.f32 %v2585_v50, 0.0 }
 0x208   :  { %v2697_v13 = vpack.c.bf16 %v2693_v12, %v2693_v12 }
 0x20a   :  { %2981 = vmatmul.bf16.vlgmr.msrb.gmra.mxu1 %v2697_v13 }
 0x20b   :  { %v2586_v16 = vpop.f32.mrf.mxu0 }
 0x213   :  { %v2636_v48 = vpop.f32.mrf.mxu0 }
 0x214   :  { %v2637_v21 = vadd.f32 %v2636_v48, %v2624_v19 }
 0x216   :  { %v2694_v17 = vmax.f32 %v2637_v21, 0.0 }
 0x217   :  { %v2675_v2 = vpop.f32.mrf.mxu2 }
 0x218   :  { %v2698_v22 = vpack.c.bf16 %v2694_v17, %v2694_v17  ;;  %v2676_v26 = vadd.f32 %v2675_v2, %v5203_v20 }
 0x21a   :  { %2994 = vmatmul.bf16.vlgmr.msrb.gmra.mxu2 %v2698_v22 }
 0x21b   :  { %v2638_v23 = vpop.f32.mrf.mxu0 }
 0x21f   :  { %v2677_v25 = vpop.f32.mrf.mxu2 }
 0x233   :  { %v2688_v27 = vpop.f32.mrf.mxu0 }
 0x234   :  { %v2689_v28 = vadd.f32 %v2688_v27, %v2676_v26 }
 0x236   :  { %v2695_v38 = vmax.f32 %v2689_v28, 0.0 }
 0x238   :  { %v2699_v30 = vpack.c.bf16 %v2695_v38, %v2695_v38 }
 0x23a   :  { %3007 = vmatmul.bf16.vlgmr.msrb.gmra.mxu0 %v2699_v30 }
 0x23b   :  { %v2690_v31 = vpop.f32.mrf.mxu0 }
 0x27d   :  { %v2969_v53 = vpop.f32.mrf.mxu3 }
 0x27e   :  { %v2970_v37 = vadd.f32 %v4828_v36, %v2969_v53 }
 0x285   :  { %v2971_v24 = vpop.f32.mrf.mxu3 }
 0x287   :  { %v2982_v42 = vpop.f32.mrf.mxu1 }
 0x288   :  { %v2983_v40 = vadd.f32 %v2982_v42, %v2970_v37 }
 0x28f   :  { %v2984_v6 = vpop.f32.mrf.mxu1 }
 0x29d   :  { %v2995_v35 = vpop.f32.mrf.mxu2 }
 0x29e   :  { %v2996_v43 = vadd.f32 %v2995_v35, %v2983_v40 }
 0x2a5   :  { %v2997_v33 = vpop.f32.mrf.mxu2 }
 0x2b7   :  { %v3008_v44 = vpop.f32.mrf.mxu0 }
 0x2b8   :  { %v3009_v45 = vadd.f32 %v3008_v44, %v2996_v43 }
 0x2ba   :  { %3012 = vst [vmem:[#allocation13] sm:$0xff] %v3009_v45 }
 0x2bb   :  { %3023 = dma.vmem_to_hbm [thread:$0]  %s3019_s9, 128, %s3021_s12, [#allocation4]  }
 0x2bf   :  { %v3010_v46 = vpop.f32.mrf.mxu0 }
 0x2c0   :  { %5005 = dma.done.wait [#allocation4], 128  }
 0x2c1   :  { %5006 = vsyncadd [#allocation4], 4294967168 }
 0x2c2   :  { %3028 = vsyncpa [#allocation3], 1 }
 0x2c3   :  { %3029 = vsyncpa [#allocation6], 1 }
 0x2c4   :  { %3030 = vsyncpa [#allocation9], 1 }
 0x2c5   :  { %3031 = vsyncpa [#allocation12], 1 }
 0x2c6   :  { %3032 = vsyncpa [#allocation4], 1 }

</bundles_post_ra>
